<compile_context>
chip_gen: v7x
topology: tpu7x:2x2x1
jax: 0.10.0
libtpu: 0.0.40
codegen_flags: <defaults>
</compile_context>

<pallas_src>
import functools

import jax
import jax.numpy as jnp
from jax import lax
from jax.experimental import pallas as pl
from jax.experimental.pallas import tpu as pltpu

OUT_LANES = 128  # lane-dense output width; wrapper slices [:, :1]


def _round_up(x, m):
    return (x + m - 1) // m * m


def _vmem_capacity_bytes():
    """Per-core VMEM capacity; conservative 64 MiB (v7x) if query fails."""
    try:
        cap = int(getattr(pltpu.get_tpu_info(), "vmem_capacity_bytes", 0))
        if cap > 0:
            return cap
    except Exception:
        pass
    return 64 << 20


# ----------------------------------------------------------------------------
# Kernels
# ----------------------------------------------------------------------------
def _residual_block(h, w1, b1, w2, b2):
    """ReLU(h + (ReLU(h@w1+b1))@w2 + b2); bf16 matmuls, f32 accumulate."""
    bf16, f32 = jnp.bfloat16, jnp.float32
    t = jnp.dot(h.astype(bf16), w1, preferred_element_type=f32)
    t = jnp.maximum(t + b1, 0.0)
    t = jnp.dot(t.astype(bf16), w2, preferred_element_type=f32)
    return jnp.maximum(h + t + b2, 0.0)


def _resident_kernel(num_blocks,
                     x_ref, w_in_ref, b_in_ref,
                     w1_ref, b1_ref, w2_ref, b2_ref,
                     w_out_ref, b_out_ref,
                     o_ref):
    """Weights fully VMEM-resident; one batch tile per grid step.

    x_ref:(TB,obs) f32   w_in:(obs,H) bf16  b_in:(1,H) f32
    w1/w2:(nb,H,H) bf16  b1/b2:(nb,1,H) f32
    w_out:(1,H) bf16     b_out:(1,1) f32    o_ref:(TB,OUT_LANES) f32
    """
    bf16, f32 = jnp.bfloat16, jnp.float32

    h = jnp.dot(x_ref[...].astype(bf16), w_in_ref[...], preferred_element_type=f32)
    h = jnp.maximum(h + b_in_ref[...], 0.0)

    if num_blocks <= 8:
        # Small block counts: static unroll (cheap, LLO-visible).
        for i in range(num_blocks):
            h = _residual_block(h, w1_ref[i], b1_ref[i], w2_ref[i], b2_ref[i])
    else:
        # Large block counts: fori_loop with a 2-block window (unroll=2) so
        # the VPU epilogue of block i overlaps the MXU pushes of block i+1
        # while keeping vreg/VMEM live ranges bounded.
        def body(i, h):
            return _residual_block(h, w1_ref[i], b1_ref[i], w2_ref[i], b2_ref[i])
        h = lax.fori_loop(0, num_blocks, body, h, unroll=2)

    # Output layer as VPU multiply + lane reduction (no 1-column MXU matmul),
    # stored lane-dense.
    v = jnp.sum(h * w_out_ref[...].astype(f32), axis=-1, keepdims=True) + b_out_ref[...]
    o_ref[...] = jnp.broadcast_to(v, o_ref.shape)


def _stream_kernel(x_ref, w_in_ref, b_in_ref,
                   w1_ref, b1_ref, w2_ref, b2_ref,
                   w_out_ref, b_out_ref,
                   o_ref, h_ref):
    """Per-block weight streaming: grid = (batch_tile, block); h carried in
    a VMEM scratch across the (innermost, 'arbitrary') block axis.

    w1/w2 blocks:(1,H,H) bf16   b1/b2 blocks:(1,1,H) f32   h_ref:(TB,H) f32
    """
    bf16, f32 = jnp.bfloat16, jnp.float32
    k = pl.program_id(1)

    @pl.when(k == 0)
    def _():
        h0 = jnp.dot(x_ref[...].astype(bf16), w_in_ref[...],
                     preferred_element_type=f32)
        h_ref[...] = jnp.maximum(h0 + b_in_ref[...], 0.0)

    h = _residual_block(h_ref[...], w1_ref[0], b1_ref[0], w2_ref[0], b2_ref[0])
    h_ref[...] = h

    @pl.when(k == pl.num_programs(1) - 1)
    def _():
        v = (jnp.sum(h * w_out_ref[...].astype(f32), axis=-1, keepdims=True)
             + b_out_ref[...])
        o_ref[...] = jnp.broadcast_to(v, o_ref.shape)


# ----------------------------------------------------------------------------
# Wrapper
# ----------------------------------------------------------------------------
def value_network_forward(x, params, num_blocks, mode=None):
    """Mirrors ValueNetwork.forward; returns (B, 1) f32.

    mode: None (auto), "resident", or "stream".
    """
    if x.ndim == 1:
        x = x[None, :]
    x = x.astype(jnp.float32)
    B, obs_dim = x.shape
    H = params["w_in"].shape[1]

    # Batch tile: multiple of 8 sublanes, capped at 256 (fills a 256x256 MXU
    # row push on v6e/v7x; two 128-row passes on v5e). Pad batch to a tile
    # multiple; padded rows are sliced off below.
    TB = min(256, _round_up(max(B, 1), 8))
    B_pad = _round_up(B, TB)
    if B_pad != B:
        x = jnp.pad(x, ((0, B_pad - B), (0, 0)))
    n_tiles = B_pad // TB

    weight_args = (params["w_in"], params["b_in"],
                   params["w1"], params["b1"],
                   params["w2"], params["b2"],
                   params["w_out"], params["b_out"])
    weight_bytes = sum(int(w.nbytes) for w in weight_args)
    big_weight_bytes = int(params["w1"].nbytes) + int(params["b1"].nbytes) \
        + int(params["w2"].nbytes) + int(params["b2"].nbytes)
    small_weight_bytes = weight_bytes - big_weight_bytes

    vmem_cap = _vmem_capacity_bytes()

    # Honest VMEM estimates per path (weights x actual buffer count).
    act_bytes = TB * H * 16 + TB * max(obs_dim, OUT_LANES) * 8   # operands/accums/h
    io_bytes = 2 * TB * obs_dim * 4 + 2 * TB * OUT_LANES * 4     # x/out, double-buffered
    est_resident = weight_bytes + io_bytes + act_bytes            # weights single-buffered
    est_stream = (2 * small_weight_bytes
                  + 2 * 2 * (H * H * 2 + H * 4)                   # w1/w2+b1/b2 double-buffered
                  + io_bytes + TB * H * 4 + act_bytes)

    if mode is None:
        fits = est_resident <= int(0.75 * vmem_cap)
        mode = "resident" if (fits and n_tiles > 2) else "stream"
    if num_blocks == 0:
        mode = "resident"   # no block axis to stream over

    flops = 2 * B_pad * (obs_dim * H + 2 * num_blocks * H * H + H)
    bytes_accessed = int(x.nbytes) + weight_bytes + B_pad * OUT_LANES * 4
    cost = pl.CostEstimate(flops=flops, transcendentals=0,
                           bytes_accessed=bytes_accessed)
    out_shape = jax.ShapeDtypeStruct((B_pad, OUT_LANES), jnp.float32)

    def run(single_buffer_weights):
        if mode == "resident":
            def wspec(shape, imap):
                if single_buffer_weights:
                    return pl.BlockSpec(shape, imap, pipeline_mode=pl.Buffered(1))
                return pl.BlockSpec(shape, imap)

            const2 = lambda i: (0, 0)
            const3 = lambda i: (0, 0, 0)
            in_specs = [
                pl.BlockSpec((TB, obs_dim), lambda i: (i, 0)),
                wspec(params["w_in"].shape, const2),
                wspec(params["b_in"].shape, const2),
                wspec(params["w1"].shape, const3),
                wspec(params["b1"].shape, const3),
                wspec(params["w2"].shape, const3),
                wspec(params["b2"].shape, const3),
                wspec(params["w_out"].shape, const2),
                wspec(params["b_out"].shape, const2),
            ]
            est = est_resident if single_buffer_weights else est_resident + weight_bytes
            vmem_limit = min(int(0.9 * vmem_cap),
                             max(int(est * 1.5) + (8 << 20), 32 << 20))
            return pl.pallas_call(
                functools.partial(_resident_kernel, num_blocks),
                out_shape=out_shape,
                grid=(n_tiles,),
                in_specs=in_specs,
                out_specs=pl.BlockSpec((TB, OUT_LANES), lambda i: (i, 0)),
                compiler_params=pltpu.CompilerParams(
                    dimension_semantics=(
                        "parallel" if n_tiles > 1 else "arbitrary",),
                    vmem_limit_bytes=vmem_limit),
                cost_estimate=cost,
            )(x, *weight_args)

        # ---- streaming path ----
        const2 = lambda i, k: (0, 0)
        blk3 = lambda i, k: (k, 0, 0)
        in_specs = [
            pl.BlockSpec((TB, obs_dim), lambda i, k: (i, 0)),
            pl.BlockSpec(params["w_in"].shape, const2),
            pl.BlockSpec(params["b_in"].shape, const2),
            pl.BlockSpec((1, H, H), blk3),
            pl.BlockSpec((1, 1, H), blk3),
            pl.BlockSpec((1, H, H), blk3),
            pl.BlockSpec((1, 1, H), blk3),
            pl.BlockSpec(params["w_out"].shape, const2),
            pl.BlockSpec(params["b_out"].shape, const2),
        ]
        vmem_limit = min(int(0.9 * vmem_cap),
                         max(int(est_stream * 1.5) + (8 << 20), 32 << 20))
        # Few batch tiles -> keep the batch axis serial so both megacore TCs
        # don't each re-stream the full weight set from HBM.
        batch_sem = "parallel" if n_tiles > 2 else "arbitrary"
        return pl.pallas_call(
            _stream_kernel,
            out_shape=out_shape,
            grid=(n_tiles, num_blocks),
            in_specs=in_specs,
            out_specs=pl.BlockSpec((TB, OUT_LANES), lambda i, k: (i, 0)),
            scratch_shapes=[pltpu.VMEM((TB, H), jnp.float32)],
            compiler_params=pltpu.CompilerParams(
                dimension_semantics=(batch_sem, "arbitrary"),
                vmem_limit_bytes=vmem_limit),
            cost_estimate=cost,
        )(x, *weight_args)

    try:
        out = jax.block_until_ready(run(single_buffer_weights=True))
    except Exception:
        # Fallback for builds that reject pl.Buffered(1) single-buffering.
        out = jax.block_until_ready(run(single_buffer_weights=False))
    return out[:B, :1]


# ----------------------------------------------------------------------------
# Init + pure-JAX reference
# ----------------------------------------------------------------------------
def init_params(key, obs_dim, hidden_dim, num_blocks, weight_dtype=jnp.bfloat16):
    """PyTorch-style uniform(-1/sqrt(fan_in), 1/sqrt(fan_in)) init.

    Weights stored (in_features, out_features) in `weight_dtype` (bf16 by
    default for the MXU); biases stay f32. w_out stored as a (1, H) row for
    the lane-dense VPU final projection.
    """
    keys = jax.random.split(key, 8)

    def unif(k, shape, fan_in):
        bound = 1.0 / jnp.sqrt(float(fan_in))
        return jax.random.uniform(k, shape, jnp.float32, -bound, bound)

    wd = weight_dtype
    return {
        "w_in": unif(keys[0], (obs_dim, hidden_dim), obs_dim).astype(wd),
        "b_in": unif(keys[1], (1, hidden_dim), obs_dim),
        "w1": unif(keys[2], (num_blocks, hidden_dim, hidden_dim), hidden_dim).astype(wd),
        "b1": unif(keys[3], (num_blocks, 1, hidden_dim), hidden_dim),
        "w2": unif(keys[4], (num_blocks, hidden_dim, hidden_dim), hidden_dim).astype(wd),
        "b2": unif(keys[5], (num_blocks, 1, hidden_dim), hidden_dim),
        "w_out": unif(keys[6], (1, hidden_dim), hidden_dim).astype(wd),
        "b_out": unif(keys[7], (1, 1), hidden_dim),
    }


def value_network_ref(x, params, num_blocks):
    """Pure-JAX reference with the same bf16-matmul / f32-accumulate semantics."""
    if x.ndim == 1:
        x = x[None, :]
    f32, bf16 = jnp.float32, jnp.bfloat16

    def mm(a, w):
        return jnp.dot(a.astype(bf16), w, preferred_element_type=f32)

    h = jax.nn.relu(mm(x.astype(f32), params["w_in"]) + params["b_in"])
    for i in range(num_blocks):
        t = jax.nn.relu(mm(h, params["w1"][i]) + params["b1"][i])
        t = mm(t, params["w2"][i]) + params["b2"][i]
        h = jax.nn.relu(h + t)
    return (jnp.sum(h * params["w_out"].astype(f32), axis=-1, keepdims=True)
            + params["b_out"])


if __name__ == "__main__":
    key = jax.random.PRNGKey(0)

    # Small, MXU-friendly demo shapes (hidden_dim multiple of 128, batch
    # multiple of 8). Cover both execution paths and both loop variants.
    configs = [
        # (batch, obs_dim, hidden_dim, num_blocks, mode)
        (8, 16, 128, 2, None),         # auto -> streaming (single batch tile)
        (8, 16, 128, 2, "resident"),   # resident weights, static unroll
        (24, 16, 128, 9, "resident"),  # resident weights, fori_loop(unroll=2)
        (24, 16, 128, 3, "stream"),    # explicit streaming, 3 blocks
    ]

    for idx, (batch, obs_dim, hidden_dim, num_blocks, mode) in enumerate(configs):
        k_params, k_x = jax.random.split(jax.random.fold_in(key, idx))
        params = init_params(k_params, obs_dim, hidden_dim, num_blocks)
        x = jax.random.normal(k_x, (batch, obs_dim), jnp.float32)

        out = jax.block_until_ready(
            value_network_forward(x, params, num_blocks, mode=mode))
        ref = value_network_ref(x, params, num_blocks)

        assert out.shape == (batch, 1), (idx, out.shape)
        assert jnp.allclose(out, ref, atol=2e-2, rtol=2e-2), (idx, out, ref)

    print("KERNEL_OK")
</pallas_src>

<mosaic_0001>
module attributes {stable_mosaic.version = 11 : i64} {
  func.func @_stream_kernel(%arg0: i32, %arg1: i32, %arg2: memref<8x16xf32, #tpu.memory_space<vmem>>, %arg3: memref<16x128xbf16, #tpu.memory_space<vmem>>, %arg4: memref<1x128xf32, #tpu.memory_space<vmem>>, %arg5: memref<1x128x128xbf16, #tpu.memory_space<vmem>>, %arg6: memref<1x1x128xf32, #tpu.memory_space<vmem>>, %arg7: memref<1x128x128xbf16, #tpu.memory_space<vmem>>, %arg8: memref<1x1x128xf32, #tpu.memory_space<vmem>>, %arg9: memref<1x128xbf16, #tpu.memory_space<vmem>>, %arg10: memref<1x1xf32, #tpu.memory_space<vmem>>, %arg11: memref<8x128xf32, #tpu.memory_space<vmem>>, %arg12: memref<8x128xf32, #tpu.memory_space<vmem>>) attributes {dimension_semantics = [#tpu.dimension_semantics<arbitrary>, #tpu.dimension_semantics<arbitrary>], iteration_bounds = array<i64: 1, 2>, scalar_prefetch = 0 : i64, scratch_operands = 1 : i64, tpu.core_type = #tpu.core_type<tc>, window_params = [{transform_indices = @transform_0, window_bounds = array<i64: 8, 16>}, {pipeline_mode = #tpu.pipeline_mode<synchronous>, transform_indices = @transform_1, window_bounds = array<i64: 16, 128>}, {pipeline_mode = #tpu.pipeline_mode<synchronous>, transform_indices = @transform_2, window_bounds = array<i64: 1, 128>}, {transform_indices = @transform_3, window_bounds = array<i64: 1, 128, 128>}, {transform_indices = @transform_4, window_bounds = array<i64: 1, 1, 128>}, {transform_indices = @transform_5, window_bounds = array<i64: 1, 128, 128>}, {transform_indices = @transform_6, window_bounds = array<i64: 1, 1, 128>}, {pipeline_mode = #tpu.pipeline_mode<synchronous>, transform_indices = @transform_7, window_bounds = array<i64: 1, 128>}, {pipeline_mode = #tpu.pipeline_mode<synchronous>, transform_indices = @transform_8, window_bounds = array<i64: 1, 1>}, {transform_indices = @transform_9, window_bounds = array<i64: 8, 128>}]} {
    %c0_i32 = arith.constant 0 : i32
    %0 = arith.cmpi eq, %arg1, %c0_i32 : i32
    %1 = arith.extui %0 : i1 to i32
    %c0_i32_0 = arith.constant 0 : i32
    %2 = arith.cmpi ne, %1, %c0_i32_0 : i32
    scf.if %2 {
      %c0_20 = arith.constant 0 : index
      %c0_21 = arith.constant 0 : index
      %29 = vector.load %arg2[%c0_20, %c0_21] : memref<8x16xf32, #tpu.memory_space<vmem>>, vector<8x16xf32>
      %30 = arith.truncf %29 : vector<8x16xf32> to vector<8x16xbf16>
      %c0_22 = arith.constant 0 : index
      %c0_23 = arith.constant 0 : index
      %31 = vector.load %arg3[%c0_22, %c0_23] : memref<16x128xbf16, #tpu.memory_space<vmem>>, vector<16x128xbf16>
      %cst_24 = arith.constant dense<0.000000e+00> : vector<8x128xf32>
      %32 = tpu.matmul %30, %31, %cst_24 {dimension_numbers = #tpu.dot_dimension_numbers<[1], [0], [0], [1], [0, 0, 1, 1], [], []>} : vector<8x16xbf16>, vector<16x128xbf16>, vector<8x128xf32> -> vector<8x128xf32>
      %c0_25 = arith.constant 0 : index
      %c0_26 = arith.constant 0 : index
      %33 = vector.load %arg4[%c0_25, %c0_26] : memref<1x128xf32, #tpu.memory_space<vmem>>, vector<1x128xf32>
      %34 = vector.broadcast %33 : vector<1x128xf32> to vector<8x128xf32>
      %35 = arith.addf %32, %34 : vector<8x128xf32>
      %cst_27 = arith.constant 0.000000e+00 : f32
      %36 = vector.broadcast %cst_27 : f32 to vector<8x128xf32>
      %37 = arith.maximumf %35, %36 : vector<8x128xf32>
      %c0_28 = arith.constant 0 : index
      %c0_29 = arith.constant 0 : index
      %38 = vector.load %arg12[%c0_28, %c0_29] : memref<8x128xf32, #tpu.memory_space<vmem>>, vector<8x128xf32>
      tpu.vector_store %arg12[%c0_28, %c0_29], %37 {strides = array<i32>} : memref<8x128xf32, #tpu.memory_space<vmem>>, vector<8x128xf32>,
    } else {
    }
    %c0 = arith.constant 0 : index
    %c0_1 = arith.constant 0 : index
    %3 = vector.load %arg12[%c0, %c0_1] : memref<8x128xf32, #tpu.memory_space<vmem>>, vector<8x128xf32>
    %c0_2 = arith.constant 0 : index
    %c0_3 = arith.constant 0 : index
    %c0_4 = arith.constant 0 : index
    %4 = vector.load %arg5[%c0_2, %c0_3, %c0_4] : memref<1x128x128xbf16, #tpu.memory_space<vmem>>, vector<1x128x128xbf16>
    %5 = vector.shape_cast %4 : vector<1x128x128xbf16> to vector<128x128xbf16>
    %c0_5 = arith.constant 0 : index
    %c0_6 = arith.constant 0 : index
    %c0_7 = arith.constant 0 : index
    %6 = vector.load %arg6[%c0_5, %c0_6, %c0_7] : memref<1x1x128xf32, #tpu.memory_space<vmem>>, vector<1x1x128xf32>
    %7 = vector.shape_cast %6 : vector<1x1x128xf32> to vector<1x128xf32>
    %c0_8 = arith.constant 0 : index
    %c0_9 = arith.constant 0 : index
    %c0_10 = arith.constant 0 : index
    %8 = vector.load %arg7[%c0_8, %c0_9, %c0_10] : memref<1x128x128xbf16, #tpu.memory_space<vmem>>, vector<1x128x128xbf16>
    %9 = vector.shape_cast %8 : vector<1x128x128xbf16> to vector<128x128xbf16>
    %c0_11 = arith.constant 0 : index
    %c0_12 = arith.constant 0 : index
    %c0_13 = arith.constant 0 : index
    %10 = vector.load %arg8[%c0_11, %c0_12, %c0_13] : memref<1x1x128xf32, #tpu.memory_space<vmem>>, vector<1x1x128xf32>
    %11 = vector.shape_cast %10 : vector<1x1x128xf32> to vector<1x128xf32>
    %12 = arith.truncf %3 : vector<8x128xf32> to vector<8x128xbf16>
    %cst = arith.constant dense<0.000000e+00> : vector<8x128xf32>
    %13 = tpu.matmul %12, %5, %cst {dimension_numbers = #tpu.dot_dimension_numbers<[1], [0], [0], [1], [0, 0, 1, 1], [], []>} : vector<8x128xbf16>, vector<128x128xbf16>, vector<8x128xf32> -> vector<8x128xf32>
    %14 = vector.broadcast %7 : vector<1x128xf32> to vector<8x128xf32>
    %15 = arith.addf %13, %14 : vector<8x128xf32>
    %cst_14 = arith.constant 0.000000e+00 : f32
    %16 = vector.broadcast %cst_14 : f32 to vector<8x128xf32>
    %17 = arith.maximumf %15, %16 : vector<8x128xf32>
    %18 = arith.truncf %17 : vector<8x128xf32> to vector<8x128xbf16>
    %cst_15 = arith.constant dense<0.000000e+00> : vector<8x128xf32>
    %19 = tpu.matmul %18, %9, %cst_15 {dimension_numbers = #tpu.dot_dimension_numbers<[1], [0], [0], [1], [0, 0, 1, 1], [], []>} : vector<8x128xbf16>, vector<128x128xbf16>, vector<8x128xf32> -> vector<8x128xf32>
    %20 = arith.addf %3, %19 : vector<8x128xf32>
    %21 = vector.broadcast %11 : vector<1x128xf32> to vector<8x128xf32>
    %22 = arith.addf %20, %21 : vector<8x128xf32>
    %cst_16 = arith.constant 0.000000e+00 : f32
    %23 = vector.broadcast %cst_16 : f32 to vector<8x128xf32>
    %24 = arith.maximumf %22, %23 : vector<8x128xf32>
    %c0_17 = arith.constant 0 : index
    %c0_18 = arith.constant 0 : index
    %25 = vector.load %arg12[%c0_17, %c0_18] : memref<8x128xf32, #tpu.memory_space<vmem>>, vector<8x128xf32>
    tpu.vector_store %arg12[%c0_17, %c0_18], %24 {strides = array<i32>} : memref<8x128xf32, #tpu.memory_space<vmem>>, vector<8x128xf32>,
    %c1_i32 = arith.constant 1 : i32
    %26 = arith.cmpi eq, %arg1, %c1_i32 : i32
    %27 = arith.extui %26 : i1 to i32
    %c0_i32_19 = arith.constant 0 : i32
    %28 = arith.cmpi ne, %27, %c0_i32_19 : i32
    scf.if %28 {
      %c0_20 = arith.constant 0 : index
      %c0_21 = arith.constant 0 : index
      %29 = vector.load %arg9[%c0_20, %c0_21] : memref<1x128xbf16, #tpu.memory_space<vmem>>, vector<1x128xbf16>
      %30 = arith.extf %29 : vector<1x128xbf16> to vector<1x128xf32>
      %31 = vector.broadcast %30 : vector<1x128xf32> to vector<8x128xf32>
      %32 = arith.mulf %24, %31 : vector<8x128xf32>
      %cst_22 = arith.constant dense<0.000000e+00> : vector<8xf32>
      %33 = vector.multi_reduction <add>, %32, %cst_22 [1] : vector<8x128xf32> to vector<8xf32>
      %34 = vector.shape_cast %33 : vector<8xf32> to vector<8x1xf32>
      %c0_23 = arith.constant 0 : index
      %c0_24 = arith.constant 0 : index
      %35 = vector.load %arg10[%c0_23, %c0_24] : memref<1x1xf32, #tpu.memory_space<vmem>>, vector<1x1xf32>
      %36 = vector.broadcast %35 : vector<1x1xf32> to vector<8x1xf32>
      %37 = arith.addf %34, %36 : vector<8x1xf32>
      %38 = vector.shape_cast %37 : vector<8x1xf32> to vector<8x1xf32>
      %39 = vector.broadcast %38 : vector<8x1xf32> to vector<8x128xf32>
      %c0_25 = arith.constant 0 : index
      %c0_26 = arith.constant 0 : index
      %40 = vector.load %arg11[%c0_25, %c0_26] : memref<8x128xf32, #tpu.memory_space<vmem>>, vector<8x128xf32>
      tpu.vector_store %arg11[%c0_25, %c0_26], %39 {strides = array<i32>} : memref<8x128xf32, #tpu.memory_space<vmem>>, vector<8x128xf32>,
    } else {
    }
    return
  }
  func.func @transform_0(%arg0: i32, %arg1: i32) -> (i32, i32) {
    %c0_i32 = arith.constant 0 : i32
    %c0_i32_0 = arith.constant 0 : i32
    return %arg0, %c0_i32 : i32, i32
  }
  func.func @transform_1(%arg0: i32, %arg1: i32) -> (i32, i32) {
    %c0_i32 = arith.constant 0 : i32
    %c0_i32_0 = arith.constant 0 : i32
    %c0_i32_1 = arith.constant 0 : i32
    return %c0_i32, %c0_i32_0 : i32, i32
  }
  func.func @transform_2(%arg0: i32, %arg1: i32) -> (i32, i32) {
    %c0_i32 = arith.constant 0 : i32
    %c0_i32_0 = arith.constant 0 : i32
    %c0_i32_1 = arith.constant 0 : i32
    return %c0_i32, %c0_i32_0 : i32, i32
  }
  func.func @transform_3(%arg0: i32, %arg1: i32) -> (i32, i32, i32) {
    %c0_i32 = arith.constant 0 : i32
    %c0_i32_0 = arith.constant 0 : i32
    %c0_i32_1 = arith.constant 0 : i32
    return %arg1, %c0_i32, %c0_i32_0 : i32, i32, i32
  }
  func.func @transform_4(%arg0: i32, %arg1: i32) -> (i32, i32, i32) {
    %c0_i32 = arith.constant 0 : i32
    %c0_i32_0 = arith.constant 0 : i32
    %c0_i32_1 = arith.constant 0 : i32
    return %arg1, %c0_i32, %c0_i32_0 : i32, i32, i32
  }
  func.func @transform_5(%arg0: i32, %arg1: i32) -> (i32, i32, i32) {
    %c0_i32 = arith.constant 0 : i32
    %c0_i32_0 = arith.constant 0 : i32
    %c0_i32_1 = arith.constant 0 : i32
    return %arg1, %c0_i32, %c0_i32_0 : i32, i32, i32
  }
  func.func @transform_6(%arg0: i32, %arg1: i32) -> (i32, i32, i32) {
    %c0_i32 = arith.constant 0 : i32
    %c0_i32_0 = arith.constant 0 : i32
    %c0_i32_1 = arith.constant 0 : i32
    return %arg1, %c0_i32, %c0_i32_0 : i32, i32, i32
  }
  func.func @transform_7(%arg0: i32, %arg1: i32) -> (i32, i32) {
    %c0_i32 = arith.constant 0 : i32
    %c0_i32_0 = arith.constant 0 : i32
    %c0_i32_1 = arith.constant 0 : i32
    return %c0_i32, %c0_i32_0 : i32, i32
  }
  func.func @transform_8(%arg0: i32, %arg1: i32) -> (i32, i32) {
    %c0_i32 = arith.constant 0 : i32
    %c0_i32_0 = arith.constant 0 : i32
    %c0_i32_1 = arith.constant 0 : i32
    return %c0_i32, %c0_i32_0 : i32, i32
  }
  func.func @transform_9(%arg0: i32, %arg1: i32) -> (i32, i32) {
    %c0_i32 = arith.constant 0 : i32
    %c0_i32_0 = arith.constant 0 : i32
    return %arg0, %c0_i32 : i32, i32
  }
}

module attributes {stable_mosaic.version = 11 : i64} {
  func.func @_stream_kernel(%arg0: i32, %arg1: i32, %arg2: memref<8x16xf32, #tpu.memory_space<vmem>>, %arg3: memref<16x128xbf16, #tpu.memory_space<vmem>>, %arg4: memref<1x128xf32, #tpu.memory_space<vmem>>, %arg5: memref<1x128x128xbf16, #tpu.memory_space<vmem>>, %arg6: memref<1x1x128xf32, #tpu.memory_space<vmem>>, %arg7: memref<1x128x128xbf16, #tpu.memory_space<vmem>>, %arg8: memref<1x1x128xf32, #tpu.memory_space<vmem>>, %arg9: memref<1x128xbf16, #tpu.memory_space<vmem>>, %arg10: memref<1x1xf32, #tpu.memory_space<vmem>>, %arg11: memref<8x128xf32, #tpu.memory_space<vmem>>, %arg12: memref<8x128xf32, #tpu.memory_space<vmem>>) attributes {dimension_semantics = [#tpu.dimension_semantics<arbitrary>, #tpu.dimension_semantics<arbitrary>], iteration_bounds = array<i64: 1, 2>, scalar_prefetch = 0 : i64, scratch_operands = 1 : i64, tpu.core_type = #tpu.core_type<tc>, window_params = [{transform_indices = @transform_0, window_bounds = array<i64: 8, 16>}, {pipeline_mode = #tpu.pipeline_mode<synchronous>, transform_indices = @transform_1, window_bounds = array<i64: 16, 128>}, {pipeline_mode = #tpu.pipeline_mode<synchronous>, transform_indices = @transform_2, window_bounds = array<i64: 1, 128>}, {transform_indices = @transform_3, window_bounds = array<i64: 1, 128, 128>}, {transform_indices = @transform_4, window_bounds = array<i64: 1, 1, 128>}, {transform_indices = @transform_5, window_bounds = array<i64: 1, 128, 128>}, {transform_indices = @transform_6, window_bounds = array<i64: 1, 1, 128>}, {pipeline_mode = #tpu.pipeline_mode<synchronous>, transform_indices = @transform_7, window_bounds = array<i64: 1, 128>}, {pipeline_mode = #tpu.pipeline_mode<synchronous>, transform_indices = @transform_8, window_bounds = array<i64: 1, 1>}, {transform_indices = @transform_9, window_bounds = array<i64: 8, 128>}]} {
    %c0_i32 = arith.constant 0 : i32
    %0 = arith.cmpi eq, %arg1, %c0_i32 : i32
    %1 = arith.extui %0 : i1 to i32
    %c0_i32_0 = arith.constant 0 : i32
    %2 = arith.cmpi ne, %1, %c0_i32_0 : i32
    scf.if %2 {
      %c0_20 = arith.constant 0 : index
      %c0_21 = arith.constant 0 : index
      %29 = vector.load %arg2[%c0_20, %c0_21] : memref<8x16xf32, #tpu.memory_space<vmem>>, vector<8x16xf32>
      %30 = arith.truncf %29 : vector<8x16xf32> to vector<8x16xbf16>
      %c0_22 = arith.constant 0 : index
      %c0_23 = arith.constant 0 : index
      %31 = vector.load %arg3[%c0_22, %c0_23] : memref<16x128xbf16, #tpu.memory_space<vmem>>, vector<16x128xbf16>
      %cst_24 = arith.constant dense<0.000000e+00> : vector<8x128xf32>
      %32 = tpu.matmul %30, %31, %cst_24 {dimension_numbers = #tpu.dot_dimension_numbers<[1], [0], [0], [1], [0, 0, 1, 1], [], []>} : vector<8x16xbf16>, vector<16x128xbf16>, vector<8x128xf32> -> vector<8x128xf32>
      %c0_25 = arith.constant 0 : index
      %c0_26 = arith.constant 0 : index
      %33 = vector.load %arg4[%c0_25, %c0_26] : memref<1x128xf32, #tpu.memory_space<vmem>>, vector<1x128xf32>
      %34 = vector.broadcast %33 : vector<1x128xf32> to vector<8x128xf32>
      %35 = arith.addf %32, %34 : vector<8x128xf32>
      %cst_27 = arith.constant 0.000000e+00 : f32
      %36 = vector.broadcast %cst_27 : f32 to vector<8x128xf32>
      %37 = arith.maximumf %35, %36 : vector<8x128xf32>
      %c0_28 = arith.constant 0 : index
      %c0_29 = arith.constant 0 : index
      %38 = vector.load %arg12[%c0_28, %c0_29] : memref<8x128xf32, #tpu.memory_space<vmem>>, vector<8x128xf32>
      tpu.vector_store %arg12[%c0_28, %c0_29], %37 {strides = array<i32>} : memref<8x128xf32, #tpu.memory_space<vmem>>, vector<8x128xf32>,
    } else {
    }
    %c0 = arith.constant 0 : index
    %c0_1 = arith.constant 0 : index
    %3 = vector.load %arg12[%c0, %c0_1] : memref<8x128xf32, #tpu.memory_space<vmem>>, vector<8x128xf32>
    %c0_2 = arith.constant 0 : index
    %c0_3 = arith.constant 0 : index
    %c0_4 = arith.constant 0 : index
    %4 = vector.load %arg5[%c0_2, %c0_3, %c0_4] : memref<1x128x128xbf16, #tpu.memory_space<vmem>>, vector<1x128x128xbf16>
    %5 = vector.shape_cast %4 : vector<1x128x128xbf16> to vector<128x128xbf16>
    %c0_5 = arith.constant 0 : index
    %c0_6 = arith.constant 0 : index
    %c0_7 = arith.constant 0 : index
    %6 = vector.load %arg6[%c0_5, %c0_6, %c0_7] : memref<1x1x128xf32, #tpu.memory_space<vmem>>, vector<1x1x128xf32>
    %7 = vector.shape_cast %6 : vector<1x1x128xf32> to vector<1x128xf32>
    %c0_8 = arith.constant 0 : index
    %c0_9 = arith.constant 0 : index
    %c0_10 = arith.constant 0 : index
    %8 = vector.load %arg7[%c0_8, %c0_9, %c0_10] : memref<1x128x128xbf16, #tpu.memory_space<vmem>>, vector<1x128x128xbf16>
    %9 = vector.shape_cast %8 : vector<1x128x128xbf16> to vector<128x128xbf16>
    %c0_11 = arith.constant 0 : index
    %c0_12 = arith.constant 0 : index
    %c0_13 = arith.constant 0 : index
    %10 = vector.load %arg8[%c0_11, %c0_12, %c0_13] : memref<1x1x128xf32, #tpu.memory_space<vmem>>, vector<1x1x128xf32>
    %11 = vector.shape_cast %10 : vector<1x1x128xf32> to vector<1x128xf32>
    %12 = arith.truncf %3 : vector<8x128xf32> to vector<8x128xbf16>
    %cst = arith.constant dense<0.000000e+00> : vector<8x128xf32>
    %13 = tpu.matmul %12, %5, %cst {dimension_numbers = #tpu.dot_dimension_numbers<[1], [0], [0], [1], [0, 0, 1, 1], [], []>} : vector<8x128xbf16>, vector<128x128xbf16>, vector<8x128xf32> -> vector<8x128xf32>
    %14 = vector.broadcast %7 : vector<1x128xf32> to vector<8x128xf32>
    %15 = arith.addf %13, %14 : vector<8x128xf32>
    %cst_14 = arith.constant 0.000000e+00 : f32
    %16 = vector.broadcast %cst_14 : f32 to vector<8x128xf32>
    %17 = arith.maximumf %15, %16 : vector<8x128xf32>
    %18 = arith.truncf %17 : vector<8x128xf32> to vector<8x128xbf16>
    %cst_15 = arith.constant dense<0.000000e+00> : vector<8x128xf32>
    %19 = tpu.matmul %18, %9, %cst_15 {dimension_numbers = #tpu.dot_dimension_numbers<[1], [0], [0], [1], [0, 0, 1, 1], [], []>} : vector<8x128xbf16>, vector<128x128xbf16>, vector<8x128xf32> -> vector<8x128xf32>
    %20 = arith.addf %3, %19 : vector<8x128xf32>
    %21 = vector.broadcast %11 : vector<1x128xf32> to vector<8x128xf32>
    %22 = arith.addf %20, %21 : vector<8x128xf32>
    %cst_16 = arith.constant 0.000000e+00 : f32
    %23 = vector.broadcast %cst_16 : f32 to vector<8x128xf32>
    %24 = arith.maximumf %22, %23 : vector<8x128xf32>
    %c0_17 = arith.constant 0 : index
    %c0_18 = arith.constant 0 : index
    %25 = vector.load %arg12[%c0_17, %c0_18] : memref<8x128xf32, #tpu.memory_space<vmem>>, vector<8x128xf32>
    tpu.vector_store %arg12[%c0_17, %c0_18], %24 {strides = array<i32>} : memref<8x128xf32, #tpu.memory_space<vmem>>, vector<8x128xf32>,
    %c1_i32 = arith.constant 1 : i32
    %26 = arith.cmpi eq, %arg1, %c1_i32 : i32
    %27 = arith.extui %26 : i1 to i32
    %c0_i32_19 = arith.constant 0 : i32
    %28 = arith.cmpi ne, %27, %c0_i32_19 : i32
    scf.if %28 {
      %c0_20 = arith.constant 0 : index
      %c0_21 = arith.constant 0 : index
      %29 = vector.load %arg9[%c0_20, %c0_21] : memref<1x128xbf16, #tpu.memory_space<vmem>>, vector<1x128xbf16>
      %30 = arith.extf %29 : vector<1x128xbf16> to vector<1x128xf32>
      %31 = vector.broadcast %30 : vector<1x128xf32> to vector<8x128xf32>
      %32 = arith.mulf %24, %31 : vector<8x128xf32>
      %cst_22 = arith.constant dense<0.000000e+00> : vector<8xf32>
      %33 = vector.multi_reduction <add>, %32, %cst_22 [1] : vector<8x128xf32> to vector<8xf32>
      %34 = vector.shape_cast %33 : vector<8xf32> to vector<8x1xf32>
      %c0_23 = arith.constant 0 : index
      %c0_24 = arith.constant 0 : index
      %35 = vector.load %arg10[%c0_23, %c0_24] : memref<1x1xf32, #tpu.memory_space<vmem>>, vector<1x1xf32>
      %36 = vector.broadcast %35 : vector<1x1xf32> to vector<8x1xf32>
      %37 = arith.addf %34, %36 : vector<8x1xf32>
      %38 = vector.shape_cast %37 : vector<8x1xf32> to vector<8x1xf32>
      %39 = vector.broadcast %38 : vector<8x1xf32> to vector<8x128xf32>
      %c0_25 = arith.constant 0 : index
      %c0_26 = arith.constant 0 : index
      %40 = vector.load %arg11[%c0_25, %c0_26] : memref<8x128xf32, #tpu.memory_space<vmem>>, vector<8x128xf32>
      tpu.vector_store %arg11[%c0_25, %c0_26], %39 {strides = array<i32>} : memref<8x128xf32, #tpu.memory_space<vmem>>, vector<8x128xf32>,
    } else {
    }
    return
  }
  func.func @transform_0(%arg0: i32, %arg1: i32) -> (i32, i32) {
    %c0_i32 = arith.constant 0 : i32
    %c0_i32_0 = arith.constant 0 : i32
    return %arg0, %c0_i32 : i32, i32
  }
  func.func @transform_1(%arg0: i32, %arg1: i32) -> (i32, i32) {
    %c0_i32 = arith.constant 0 : i32
    %c0_i32_0 = arith.constant 0 : i32
    %c0_i32_1 = arith.constant 0 : i32
    return %c0_i32, %c0_i32_0 : i32, i32
  }
  func.func @transform_2(%arg0: i32, %arg1: i32) -> (i32, i32) {
    %c0_i32 = arith.constant 0 : i32
    %c0_i32_0 = arith.constant 0 : i32
    %c0_i32_1 = arith.constant 0 : i32
    return %c0_i32, %c0_i32_0 : i32, i32
  }
  func.func @transform_3(%arg0: i32, %arg1: i32) -> (i32, i32, i32) {
    %c0_i32 = arith.constant 0 : i32
    %c0_i32_0 = arith.constant 0 : i32
    %c0_i32_1 = arith.constant 0 : i32
    return %arg1, %c0_i32, %c0_i32_0 : i32, i32, i32
  }
  func.func @transform_4(%arg0: i32, %arg1: i32) -> (i32, i32, i32) {
    %c0_i32 = arith.constant 0 : i32
    %c0_i32_0 = arith.constant 0 : i32
    %c0_i32_1 = arith.constant 0 : i32
    return %arg1, %c0_i32, %c0_i32_0 : i32, i32, i32
  }
  func.func @transform_5(%arg0: i32, %arg1: i32) -> (i32, i32, i32) {
    %c0_i32 = arith.constant 0 : i32
    %c0_i32_0 = arith.constant 0 : i32
    %c0_i32_1 = arith.constant 0 : i32
    return %arg1, %c0_i32, %c0_i32_0 : i32, i32, i32
  }
  func.func @transform_6(%arg0: i32, %arg1: i32) -> (i32, i32, i32) {
    %c0_i32 = arith.constant 0 : i32
    %c0_i32_0 = arith.constant 0 : i32
    %c0_i32_1 = arith.constant 0 : i32
    return %arg1, %c0_i32, %c0_i32_0 : i32, i32, i32
  }
  func.func @transform_7(%arg0: i32, %arg1: i32) -> (i32, i32) {
    %c0_i32 = arith.constant 0 : i32
    %c0_i32_0 = arith.constant 0 : i32
    %c0_i32_1 = arith.constant 0 : i32
    return %c0_i32, %c0_i32_0 : i32, i32
  }
  func.func @transform_8(%arg0: i32, %arg1: i32) -> (i32, i32) {
    %c0_i32 = arith.constant 0 : i32
    %c0_i32_0 = arith.constant 0 : i32
    %c0_i32_1 = arith.constant 0 : i32
    return %c0_i32, %c0_i32_0 : i32, i32
  }
  func.func @transform_9(%arg0: i32, %arg1: i32) -> (i32, i32) {
    %c0_i32 = arith.constant 0 : i32
    %c0_i32_0 = arith.constant 0 : i32
    return %arg0, %c0_i32 : i32, i32
  }
}

</mosaic_0001>

<bundles_post_ra>
// kernel: tpu_custom_call.1
= control target key start
LH: loop header
LB: loop body
LE: loop exit
PB: predicated region body
PF: predicated region fallthrough
CT: control target
= control target key end

     0   :  { %s1712_s0 = inlined_call_operand.hbm [shape: f32[8,16], index: 0, kind: input, shape index: {}]   ;;  %s1713_s1 = inlined_call_operand.hbm [shape: bf16[16,128], index: 1, kind: input, shape index: {}]   ;;  %s1714_s2 = inlined_call_operand.vmem [shape: f32[1,128], index: 2, kind: input, shape index: {}]   ;;  %s1715_s3 = inlined_call_operand.hbm [shape: bf16[2,128,128], index: 3, kind: input, shape index: {}]   ;;  %s1716_s4 = inlined_call_operand.vmem [shape: f32[2,1,128], index: 4, kind: input, shape index: {}]   ;;  %s1717_s5 = inlined_call_operand.hbm [shape: bf16[2,128,128], index: 5, kind: input, shape index: {}]   ;;  %s1718_s6 = inlined_call_operand.vmem [shape: f32[2,1,128], index: 6, kind: input, shape index: {}]   ;;  %s1719_s7 = inlined_call_operand.vmem [shape: bf16[1,128], index: 7, kind: input, shape index: {}]   ;;  %s1720_s8 = inlined_call_operand.<no memory space> [shape: f32[1,1], index: 8, kind: input, shape index: {}]   ;;  %s1721_s9 = inlined_call_operand.hbm [shape: f32[8,128], index: 9, kind: output, shape index: {}]  }
   0x1   :  { %1734 = sst [smem:[#allocation20_spill]] %s1712_s0  ;;  %v14_v0 = vstv %s1720_s8 }
   0x2   :  { %1735 = sst [smem:[#allocation21_spill]] %s1715_s3  ;;  %15 = vst [vmem:[#allocation3] sm:$0x1] %v14_v0 }
   0x3   :  { %1736 = sst [smem:[#allocation22_spill]] %s1721_s9 }
   0x4   :  { %16 = vsyncpa [#allocation5], 0 }
   0x5   :  { %17 = vsyncpa [#allocation8], 0 }
   0x6   :  { %18 = vsyncpa [#allocation6], 0  ;;  %s1405_s11 = smov 0   ;;  %s1407_s12 = smov 0  }
   0x7   :  { %s1409_s13 = smov 0   ;;  %s1411_s14 = smov 0  }
   0x8   :  { %s1413_s15 = smov 0   ;;  %s1415_s16 = smov 0  }
   0x9 LB: > { %1737 = sst [smem:[#allocation16_spill]] %s1326_s13  ;;  %s1434_s8 = sadd.s32 4294967295, %s1338_s16   ;;  %s1338_s16 = sphi %s1415_s16, %s24_s16   ;;  %s1334_s15 = sphi %s1413_s15, %s1768_s15   ;;  %s1330_s14 = sphi %s1411_s14, %s1767_s14   ;;  %s1326_s13 = sphi %s1409_s13, %s1763_s13   ;;  %s1322_s12 = sphi %s1407_s12, %s1766_s12   ;;  %s1318_s11 = sphi %s1405_s11, %s1765_s11  }
   0xa   : > { %1738 = sst [smem:[#allocation17_spill]] %s1338_s16  ;;  %s111_s17 = sadd.s32 1, %s1326_s13 }
   0xb   : > { %p118_p0 = scmp.ne.s32.totalorder %s1326_s13, %s1322_s12  ;;  %p119_p1 = scmp.eq.s32.totalorder %s1338_s16, 0 }
   0xc   : > { %p124_p2 = scmp.ne.s32.totalorder %s1322_s12, %s1318_s11  ;;  %p1722_p3 = scmp.eq.s32.totalorder %s1434_s8, 0 }
   0xd   : > { %p120_p4 = por %p119_p1, %p118_p0  ;;  %p910_p5 = scmp.ge.s32.totalorder %s1338_s16, 1 }
   0xe   : > { %p1445_p6 = por %p1722_p3, %p124_p2  ;;  %p281_p7 = scmp.lt.s32.totalorder %s1338_s16, 3 }
   0xf   : > { %s1340_s20 = smov [#allocation4]   ;;  %p1053_p10 = scmp.lt.s32.totalorder %s1338_s16, 2 }
  0x10   : > { %s1739_s18 = scalar_select %p1445_p6, 1, 0 }
  0x11   : > { %p1450_p8 = pnand %p910_p5, %p281_p7  ;;  %s296_s21 = sshll.u32 %s1340_s20, 4  ;;  %s297_s21 = int_to_ptr.vmem [resolvable:$true] %s296_s21 }
  0x12   : > { %p1463_p12 = pnand %p1053_p10, %p120_p4  ;;  %s1743_s0 = sld [smem:[#allocation20_spill]] }
  0x13   : > { %s1740_s19 = scalar_select %p1450_p8, 1, 0 }
  0x14   : > { %p1037_p9 = pneg %p1450_p8 }
  0x15   : > { %s1742_s23 = scalar_select %p1463_p12, 1, 0 }
  0x16   : > { %p1459_p11 = pnand %p1037_p9, %p1722_p3 }
  0x18   : > { %s1134_s26 = scalar_lea.hbm %s1743_s0, 128  ;;  %p1728_p0 = pneg %p1459_p11 }
  0x19   : > { %p1135_p13 = scmp.ne.s32.totalorder %s1743_s0, %s1134_s26  ;;  %p1141_p4 = scmp.lt.u32.totalorder %s1134_s26, %s1743_s0 }
  0x1b   : > { %p1137_p1 = pnand %p1728_p0, %p1135_p13 }
  0x1d   : > { %p1138_p2 = pneg %p1137_p1 }
  0x1f   : > { %p1143_p5 = pnand %p1141_p4, %p1138_p2 }
  0x21   : > { %1146 = shalt.err (!%p1143_p5)
}
  0x22   : > { %s1147_s10 = scalar_lea.vmem %s297_s21, 128  ;;  %p1155_p3 = scmp.lt.s32.totalorder %s297_s21, %s297_s21 }
  0x23   : > { %p1148_p7 = scmp.ne.s32.totalorder %s297_s21, %s1147_s10  ;;  %p1156_p6 = scmp.lt.s32.totalorder %s1147_s10, %s1147_s10 }
  0x25   : > { %p1150_p9 = pnand %p1148_p7, %p1728_p0  ;;  %p1157_p8 = por %p1156_p6, %p1155_p3 }
  0x27   : > { %p1151_p10 = pneg %p1150_p9 }
  0x29   : > { %p1158_p12 = pnand %p1157_p8, %p1151_p10 }
  0x2b   : > { %1161 = shalt.err (!%p1158_p12)
}
  0x2c   : > { %1040 = dma.hbm_to_vmem [thread:$0]  (!%p1459_p11), %s1743_s0, 128, %s297_s21, [#allocation5]  }
  0x2d   : > { %s33_s24 = sadd.s32 1, %s1334_s15  ;;  %s329_s25 = sand.u32 1, %s1338_s16  }
  0x2e   : > { %p34_p3 = scmp.ge.s32.totalorder %s33_s24, 2  ;;  %s331_s26 = sand.u32 1, %s1326_s13  }
  0x2f   : > { %s1727_s27 = sshll.u32 %s1334_s15, 10  ;;  %s1495_s28 = sshll.u32 %s331_s26, 6 }
  0x30   : > { %s1770_s24 = smov (%p34_p3, %s33_s24), 0  ;;  %s1745_s3 = sld [smem:[#allocation21_spill]] }
  0x31   : > { %1744 = sst [smem:[#allocation18_spill]] %s1770_s24  ;;  %s108_s21 = ssub.s32 %s1334_s15, %s1770_s24 }
  0x32   : > { %p109_p6 = scmp.eq.s32.totalorder %s108_s21, 0  ;;  %s333_s11 = scalar_lea.vmem [#allocation9], %s1495_s28 }
  0x33   : > { %s340_s20 = sshll.u32 %s333_s11, 4  ;;  %s1514_s0 = scalar_lea.sflag [#allocation5], %s329_s25  ;;  %s1507_s20 = int_to_ptr.vmem [resolvable:$true] %s340_s20 }
  0x34   : > { %s1512_s26 = scalar_select %p109_p6, %s1326_s13, %s111_s17  }
  0x35   : > { %p1747_p12 = scmp.ne.s32.totalorder %s1742_s23, 0 }
  0x36   : > { %s1502_s10 = scalar_lea.hbm %s1745_s3, %s1727_s27  ;;  %1746 = sst [smem:[#allocation19_spill]] %s1512_s26 }
  0x37   : > { %s1162_s16 = scalar_lea.hbm %s1502_s10, 1024  ;;  %p1732_p13 = pneg %p1747_p12 }
  0x38   : > { %p1163_p8 = scmp.ne.s32.totalorder %s1502_s10, %s1162_s16  ;;  %s1167_s21 = scalar_lea.hbm %s1745_s3, 2048 }
  0x39   : > { %p1168_p4 = scmp.lt.u32.totalorder %s1502_s10, %s1745_s3  ;;  %p1169_p5 = scmp.lt.u32.totalorder %s1167_s21, %s1162_s16 }
  0x3a   : > { %p1165_p1 = pnand %p1732_p13, %p1163_p8  ;;  %p1171_p9 = scmp.lt.u32.totalorder %s1162_s16, %s1502_s10 }
  0x3b   : > { %p1170_p7 = por %p1169_p5, %p1168_p4 }
  0x3c   : > { %p1166_p2 = pneg %p1165_p1 }
  0x3d   : > { %p1172_p10 = por %p1171_p9, %p1170_p7 }
  0x3f   : > { %p1173_p3 = pnand %p1172_p10, %p1166_p2 }
  0x41   : > { %1176 = shalt.err (!%p1173_p3)
}
  0x42   : > { %s1177_s17 = scalar_lea.vmem %s1507_s20, 1024  ;;  %s1341_s25 = smov [#allocation9]  }
  0x43   : > { %p1178_p6 = scmp.ne.s32.totalorder %s1507_s20, %s1177_s17  ;;  %s1182_s29 = sshll.u32 %s1341_s25, 4  ;;  %s1183_s29 = int_to_ptr.vmem [resolvable:$false] %s1182_s29 }
  0x44   : > { %s1184_s27 = scalar_lea.vmem %s1183_s29, 2048  ;;  %p1185_p0 = scmp.lt.s32.totalorder %s1507_s20, %s1183_s29 }
  0x45   : > { %p1180_p8 = pnand %p1178_p6, %p1732_p13  ;;  %p1186_p4 = scmp.lt.s32.totalorder %s1184_s27, %s1177_s17 }
  0x47   : > { %p1181_p1 = pneg %p1180_p8  ;;  %p1187_p5 = por %p1186_p4, %p1185_p0 }
  0x49   : > { %p1188_p7 = pnand %p1187_p5, %p1181_p1 }
  0x4b   : > { %1191 = shalt.err (!%p1188_p7)
}
  0x4c   : > { %s1342_s16 = smov 64   ;;  %s1343_s30 = smov 4  }
  0x4d   : > { %1047 = dma.hbm_to_vmem [thread:$0]  (!%p1747_p12), %s1502_s10, 1024, %s1507_s20, %s1514_s0, %s1342_s16, %s1342_s16, %s1343_s30  }
  0x4e   : > { %s1344_s21 = smov [#allocation7]   ;;  %s1748_s17 = sshll.u32 %s1334_s15, 10 }
  0x4f   : > { %s306_s11 = sshll.u32 %s1344_s21, 4  ;;  %s1550_s27 = scalar_lea.hbm %s1717_s5, %s1748_s17  ;;  %s307_s11 = int_to_ptr.vmem [resolvable:$true] %s306_s11 }
  0x50   : > { %s1192_s26 = scalar_lea.hbm %s1713_s1, 128  ;;  %p1749_p2 = pneg %p1459_p11 }
  0x51   : > { %p1193_p0 = scmp.ne.s32.totalorder %s1713_s1, %s1192_s26  ;;  %p1199_p3 = scmp.lt.u32.totalorder %s1192_s26, %s1713_s1 }
  0x53   : > { %p1195_p9 = pnand %p1193_p0, %p1749_p2 }
  0x55   : > { %p1196_p10 = pneg %p1195_p9 }
  0x57   : > { %p1201_p6 = pnand %p1199_p3, %p1196_p10 }
  0x59   : > { %1204 = shalt.err (!%p1201_p6)
}
  0x5a   : > { %s1205_s21 = scalar_lea.vmem %s307_s11, 128  ;;  %p1750_p1 = pmov %p1749_p2 }
  0x5b   : > { %p1206_p8 = scmp.ne.s32.totalorder %s307_s11, %s1205_s21  ;;  %p1213_p7 = scmp.lt.s32.totalorder %s307_s11, %s307_s11 }
  0x5c   : > { %p1214_p13 = scmp.lt.s32.totalorder %s1205_s21, %s1205_s21 }
  0x5d   : > { %p1208_p4 = pnand %p1206_p8, %p1750_p1 }
  0x5e   : > { %p1215_p12 = por %p1214_p13, %p1213_p7 }
  0x5f   : > { %p1209_p5 = pneg %p1208_p4 }
  0x61   : > { %p1216_p0 = pnand %p1215_p12, %p1209_p5 }
  0x63   : > { %1219 = shalt.err (!%p1216_p0)
}
  0x64   : > { %1043 = dma.hbm_to_vmem [thread:$0]  (!%p1459_p11), %s1713_s1, 128, %s307_s11, [#allocation8], %s1342_s16, %s1342_s16, %s1343_s30  }
  0x65   : > { %s360_s13 = scalar_lea.vmem [#allocation10], %s1495_s28  ;;  %s1220_s26 = scalar_lea.hbm %s1550_s27, 1024 }
  0x66   : > { %s367_s24 = sshll.u32 %s360_s13, 4  ;;  %p1221_p12 = scmp.ne.s32.totalorder %s1550_s27, %s1220_s26  ;;  %s1576_s24 = int_to_ptr.vmem [resolvable:$true] %s367_s24 }
  0x67   : > { %p1751_p13 = scmp.ne.s32.totalorder %s1742_s23, 0  ;;  %s1225_s25 = scalar_lea.hbm %s1717_s5, 2048 }
  0x68   : > { %p1226_p3 = scmp.lt.u32.totalorder %s1550_s27, %s1717_s5  ;;  %p1227_p6 = scmp.lt.u32.totalorder %s1225_s25, %s1220_s26 }
  0x69   : > { %p1752_p2 = pneg %p1751_p13  ;;  %p1229_p8 = scmp.lt.u32.totalorder %s1220_s26, %s1550_s27 }
  0x6a   : > { %p1228_p11 = por %p1227_p6, %p1226_p3 }
  0x6b   : > { %p1223_p9 = pnand %p1221_p12, %p1752_p2 }
  0x6c   : > { %p1230_p1 = por %p1229_p8, %p1228_p11 }
  0x6d   : > { %p1224_p10 = pneg %p1223_p9 }
  0x6f   : > { %p1231_p4 = pnand %p1230_p1, %p1224_p10 }
  0x71   : > { %1234 = shalt.err (!%p1231_p4)
}
  0x72   : > { %s1235_s28 = scalar_lea.vmem %s1576_s24, 1024  ;;  %p1753_p7 = pmov %p1752_p2 }
  0x73   : > { %p1236_p5 = scmp.ne.s32.totalorder %s1576_s24, %s1235_s28  ;;  %s1345_s11 = smov [#allocation10]  }
  0x74   : > { %s1240_s20 = sshll.u32 %s1345_s11, 4  ;;  %s1241_s20 = int_to_ptr.vmem [resolvable:$false] %s1240_s20 }
  0x75   : > { %p1238_p0 = pnand %p1236_p5, %p1753_p7  ;;  %s1242_s21 = scalar_lea.vmem %s1241_s20, 2048 }
  0x76   : > { %p1243_p2 = scmp.lt.s32.totalorder %s1576_s24, %s1241_s20  ;;  %p1244_p9 = scmp.lt.s32.totalorder %s1242_s21, %s1235_s28 }
  0x77   : > { %p1239_p12 = pneg %p1238_p0 }
  0x78   : > { %p1245_p3 = por %p1244_p9, %p1243_p2 }
  0x7a   : > { %p1246_p6 = pnand %p1245_p3, %p1239_p12 }
  0x7c   : > { %1249 = shalt.err (!%p1246_p6)
}
  0x7d   : > { %1050 = dma.hbm_to_vmem [thread:$0]  (!%p1751_p13), %s1550_s27, 1024, %s1576_s24, %s1514_s0, %s1342_s16, %s1342_s16, %s1343_s30  }
  0x7e   : > { %p1754_p10 = scmp.ne.s32.totalorder %s1740_s19, 0 }
  0x7f   : > { %p1755_p11 = scmp.eq.s32.totalorder (!%p1754_p10), %s1434_s8, 0 }
  0x80   : > { %385 = sbr.rel (%p1754_p10) target bundleno = 1145 (0x479), region = 56 }
  0x87   : > { %1301 = dma.done.wait (%p1755_p11), [#allocation5], 128   ;;  %p1756_p8 = pmov %p1755_p11 }
  0x89   : > { %1303 = vsyncadd (%p1756_p8), [#allocation5], 4294967168  ;;  %p1757_p1 = pmov %p1756_p8 }
  0x8b   : > { %1305 = dma.done.wait (%p1757_p1), [#allocation8], 128   ;;  %p1758_p4 = pmov %p1757_p1 }
  0x8c   : > { %s395_s23 = sand.u32 1, %s1434_s8   ;;  %s397_s0 = sand.u32 1, %s1322_s12  }
  0x8d   : > { %1307 = vsyncadd (%p1758_p4), [#allocation8], 4294967168  ;;  %s923_s16 = sshll.u32 %s397_s0, 6  ;;  %s396_s19 = scalar_lea.sflag [#allocation5], %s395_s23 }
  0x8e   : > { %s1617_s30 = scalar_lea.vmem [#allocation9], %s923_s16  ;;  %p1759_p13 = scmp.ne.s32.totalorder %s1739_s18, 0 }
  0x90   : > { %1309 = dma.done.wait (%p1759_p13), %s396_s19, 2048  }
  0x91   : > { %1311 = vsyncadd (%p1759_p13), %s396_s19, 4294965248  ;;  %p449_p5 = scmp.lt.s32.totalorder %s1330_s14, 1  ;;  %s1635_s17 = scalar_lea.vmem [#allocation10], %s923_s16 }
  0x92   : > { %p925_p7 = scmp.ne.s32.totalorder %s1330_s14, 0 }
  0x93   : > { %s1625_s27 = scalar_select %p449_p5, %s1330_s14, 1 }
  0x94   : > { %459 = sbr.rel (%p925_p7) target bundleno = 370 (0x172), region = 76  ;;  %v1116_v1 = vld [vmem:[#allocation7] sm:$0xff] (!%p925_p7)   ;;  %v1346_v2 = vmov (!%p925_p7), 0.0   ;;  %v460_v3 = vld [vmem:[#allocation4] sm:$0xff] (!%p925_p7)  ;;  %vm1347_vm0 = vmmov (!%p925_p7), 0   ;;  %vm477_vm1 = vcmask (!%p925_p7), 130048  }
  0x95   : > { %s451_s13 = scalar_lea.vmem %s1716_s4, %s1625_s27  ;;  %s454_s22 = scalar_lea.vmem %s1718_s6, %s1625_s27  ;;  %975 = vmatprep.subr.bf16.mxu0 (!%p925_p7), %v1346_v2  ;;  %977 = vmatprep.mubr.msk.bf16.mxu0 (!%p925_p7), %vm1347_vm0, %v1346_v2  ;;  %v461_v4 = vpack.c.bf16 (!%p925_p7), %v460_v3, %v460_v3  ;;  %v926_v5 = vld [vmem:[%s1714_s2] ss:$0 sm:$0xff] (!%p925_p7) }
  0x96   : > { %976 = vmatpush3.bf16.msra.mxu0 (!%p925_p7), %v1116_v1 }
  0x99   : > { %978 = vmatmul.mubr.msk.bf16.vlgmr.msra.gmra.mrb[0].mxu0 (!%p925_p7), %vm477_vm1, %v461_v4 }
 0x16c   : > { %v515_v6 = vpop.f32.mrb[0].mxu0 }
 0x16d   : > { %v516_v7 = vadd.f32 %v926_v5, %v515_v6  ;;  %v979_v8 = vpop.f32.mrb[1].mxu0 }
 0x16e   : > { %v518_v9 = vpop.f32.mrb[2].mxu0 }
 0x16f   : > { %v521_v10 = vmax.f32 %v516_v7, 0.0  ;;  %v980_v11 = vpop.f32.mrb[3].mxu0 }
 0x171   : > { %522 = vst [vmem:[#allocation2] sm:$0xff] %v521_v10 }
 0x172 PF: > { %v1117_v12 = vld [vmem:[%s1617_s30] sm:$0xff]   ;;  %v1348_v13 = vmov 0.0   ;;  %v1118_v14 = vld [vmem:[%s1617_s30 + $0x8] sm:$0xff]   ;;  %vm1349_vm2 = vmmov 0   ;;  %v1119_v15 = vld [vmem:[%s1617_s30 + $0x10] sm:$0xff]   ;;  %p947_p0 = scmp.ne.s32.totalorder %s1330_s14, 1 }
 0x173   : > { %981 = vmatprep.subr.bf16.mxu0 %v1348_v13  ;;  %1001 = vmatprep.subr.bf16.mxu1 %v1348_v13  ;;  %v1125_v16 = vld [vmem:[%s1635_s17] sm:$0xff]   ;;  %v1120_v17 = vld [vmem:[%s1617_s30 + $0x18] sm:$0xff]   ;;  %v1126_v18 = vld [vmem:[%s1635_s17 + $0x8] sm:$0xff]   ;;  %v759_v48 = vlaneseq (!%p947_p0)  ;;  %v1350_v54 = vmov (!%p947_p0), 0  }
 0x174   : > { %982 = vmatpush3.bf16.msra.mxu0 %v1117_v12  ;;  %997 = vmatprep.mubr.msk.bf16.mxu0 %vm1349_vm2, %v1348_v13  ;;  %v1121_v19 = vld [vmem:[%s1617_s30 + $0x20] sm:$0xff]   ;;  %v1127_v20 = vld [vmem:[%s1635_s17 + $0x10] sm:$0xff]   ;;  %v1122_v21 = vld [vmem:[%s1617_s30 + $0x28] sm:$0xff]  }
 0x175   : > { %983 = vmatprep.subr.bf16.mxu0 %v1348_v13  ;;  %1017 = vmatprep.mubr.msk.bf16.mxu1 %vm1349_vm2, %v1348_v13  ;;  %v1128_v22 = vld [vmem:[%s1635_s17 + $0x18] sm:$0xff]   ;;  %v1123_v23 = vld [vmem:[%s1617_s30 + $0x30] sm:$0xff]   ;;  %v1129_v24 = vld [vmem:[%s1635_s17 + $0x20] sm:$0xff]   ;;  %v760_v50 = vshrl.u32 (!%p947_p0), %v759_v48, 7 }
 0x176   : > { %1002 = vmatpush3.bf16.msra.mxu1 %v1125_v16  ;;  %v1124_v25 = vld [vmem:[%s1617_s30 + $0x38] sm:$0xff]   ;;  %v1130_v27 = vld [vmem:[%s1635_s17 + $0x28] sm:$0xff]   ;;  %v1131_v29 = vld [vmem:[%s1635_s17 + $0x30] sm:$0xff]   ;;  %1133 = vset.pattern.permute.xlu0 (!%p947_p0), %v1350_v54 }
 0x177   : > { %1003 = vmatprep.subr.bf16.mxu1 %v1348_v13  ;;  %v1132_v30 = vld [vmem:[%s1635_s17 + $0x38] sm:$0xff]   ;;  %v929_v31 = vld [vmem:[%s451_s13] ss:$0 sm:$0xff]  ;;  %v761_v51 = vsub.s32 (!%p947_p0), 0, %v760_v50  ;;  %v948_v55 = vld [vmem:[#allocation3] ss:$0 sm:$0xff] (!%p947_p0) }
 0x178   : > { %984 = vmatpush3.bf16.msra.mxu0 %v1118_v14  ;;  %v523_v26 = vld [vmem:[#allocation2] sm:$0xff] }
 0x179   : > { %985 = vmatprep.subr.bf16.mxu0 %v1348_v13  ;;  %v558_v28 = vpack.c.bf16 %v523_v26, %v523_v26  ;;  %v946_v39 = vld [vmem:[%s454_s22] ss:$0 sm:$0xff] }
 0x17a   : > { %1004 = vmatpush3.bf16.msra.mxu1 %v1126_v18  ;;  %v757_v47 = vld [vmem:[%s1719_s7] sm:$0x1] (!%p947_p0) }
 0x17b   : > { %1005 = vmatprep.subr.bf16.mxu1 %v1348_v13  ;;  %v758_v49 = vunpack.c.l.bf16 (!%p947_p0), %v757_v47 }
 0x17c   : > { %986 = vmatpush3.bf16.msra.mxu0 %v1119_v15 }
 0x17d   : > { %987 = vmatprep.subr.bf16.mxu0 %v1348_v13  ;;  %v762_v52 = vrot.slane (!%p947_p0), %v758_v49, %v761_v51 }
 0x17e   : > { %1006 = vmatpush3.bf16.msra.mxu1 %v1127_v20 }
 0x17f   : > { %1007 = vmatprep.subr.bf16.mxu1 %v1348_v13 }
 0x180   : > { %988 = vmatpush3.bf16.msra.mxu0 %v1120_v17 }
 0x181   : > { %989 = vmatprep.subr.bf16.mxu0 %v1348_v13 }
 0x182   : > { %1008 = vmatpush3.bf16.msra.mxu1 %v1128_v22 }
 0x183   : > { %1009 = vmatprep.subr.bf16.mxu1 %v1348_v13 }
 0x184   : > { %990 = vmatpush3.bf16.msra.mxu0 %v1121_v19 }
 0x185   : > { %991 = vmatprep.subr.bf16.mxu0 %v1348_v13 }
 0x186   : > { %1010 = vmatpush3.bf16.msra.mxu1 %v1129_v24 }
 0x187   : > { %1011 = vmatprep.subr.bf16.mxu1 %v1348_v13 }
 0x188   : > { %992 = vmatpush3.bf16.msra.mxu0 %v1122_v21 }
 0x189   : > { %993 = vmatprep.subr.bf16.mxu0 %v1348_v13 }
 0x18a   : > { %1012 = vmatpush3.bf16.msra.mxu1 %v1130_v27 }
 0x18b   : > { %1013 = vmatprep.subr.bf16.mxu1 %v1348_v13 }
 0x18c   : > { %994 = vmatpush3.bf16.msra.mxu0 %v1123_v23 }
 0x18d   : > { %995 = vmatprep.subr.bf16.mxu0 %v1348_v13 }
 0x18e   : > { %1014 = vmatpush3.bf16.msra.mxu1 %v1131_v29 }
 0x18f   : > { %1015 = vmatprep.subr.bf16.mxu1 %v1348_v13 }
 0x190   : > { %996 = vmatpush3.bf16.msra.mxu0 %v1124_v25 }
 0x192   : > { %1016 = vmatpush3.bf16.msra.mxu1 %v1132_v30 }
 0x193   : > { %998 = vmatmul.mubr.bf16.vlgmr.msra.gmra.mrb[0].mxu0 %v558_v28 }
 0x266   : > { %v647_v32 = vpop.f32.mrb[0].mxu0 }
 0x267   : > { %v648_v33 = vadd.f32 %v929_v31, %v647_v32  ;;  %v999_v34 = vpop.f32.mrb[1].mxu0 }
 0x268   : > { %v650_v35 = vpop.f32.mrb[2].mxu0 }
 0x269   : > { %v653_v36 = vmax.f32 %v648_v33, 0.0  ;;  %v1000_v37 = vpop.f32.mrb[3].mxu0 }
 0x26b   : > { %v654_v38 = vpack.c.bf16 %v653_v36, %v653_v36 }
 0x26d   : > { %1018 = vmatmul.mubr.bf16.vlgmr.msra.gmra.mrb[0].mxu1 %v654_v38 }
 0x340   : > { %v737_v40 = vpop.f32.mrb[0].mxu1 }
 0x341   : > { %v743_v41 = vadd.f32 %v737_v40, %v523_v26  ;;  %v1019_v42 = vpop.f32.mrb[1].mxu1  ;;  %756 = sbr.rel (%p947_p0) target bundleno = 1114 (0x45a), region = 80 }
 0x342   : > { %v740_v43 = vpop.f32.mrb[2].mxu1 }
 0x343   : > { %v750_v44 = vadd.f32 %v946_v39, %v743_v41  ;;  %v1020_v45 = vpop.f32.mrb[3].mxu1 }
 0x345   : > { %v751_v46 = vmax.f32 %v750_v44, 0.0 }
 0x347   : > { %752 = vst [vmem:[#allocation2] sm:$0xff] %v751_v46  ;;  %v763_v53 = vmul.f32 (!%p947_p0), %v762_v52, %v751_v46 }
 0x349   : > { %764 = vadd.xlane.f32.xlu0 %v763_v53 }
 0x3d6   : > { %v765_v56 = vpop.xlane.xlu0 %764 }
 0x3d7   : > { %v773_v57 = vadd.f32 %v948_v55, %v765_v56 }
 0x3d9   : > { %776 = vperm.xlu0 %1133, %v773_v57  }
 0x458   : > { %v777_v58 = vpop.permute.xlu0 %776 }
 0x459   : > { %779 = vst [vmem:[#allocation11] sm:$0xff] %v777_v58 }
 0x45a PF: > { %p1056_p12 = scmp.eq.s32.totalorder %s1434_s8, 1  ;;  %s1351_s14 = smov [#allocation11]  }
 0x45b   : > { %s789_s23 = sshll.u32 %s1351_s14, 4  ;;  %s790_s23 = int_to_ptr.vmem [resolvable:$true] %s789_s23 }
 0x45c   : > { %s1250_s0 = scalar_lea.vmem %s790_s23, 128  ;;  %p1257_p6 = scmp.lt.s32.totalorder %s790_s23, %s790_s23 }
 0x45d   : > { %p1251_p2 = scmp.ne.s32.totalorder %s790_s23, %s1250_s0  ;;  %p1258_p10 = scmp.lt.s32.totalorder %s1250_s0, %s1250_s0 }
 0x45f   : > { %p1252_p9 = pnand %p1251_p2, %p1056_p12  ;;  %p1259_p11 = por %p1258_p10, %p1257_p6 }
 0x461   : > { %p1253_p3 = pneg %p1252_p9 }
 0x463   : > { %p1260_p8 = pnand %p1259_p11, %p1253_p3 }
 0x465   : > { %1263 = shalt.err (!%p1260_p8)
}
 0x466   : > { %s1760_s30 = sld [smem:[#allocation22_spill]] }
 0x46c   : > { %s1264_s27 = scalar_lea.hbm %s1760_s30, 128 }
 0x46d   : > { %p1265_p1 = scmp.ne.s32.totalorder %s1760_s30, %s1264_s27  ;;  %p1270_p5 = scmp.lt.u32.totalorder %s1264_s27, %s1760_s30 }
 0x46f   : > { %p1266_p4 = pnand %p1265_p1, %p1056_p12 }
 0x471   : > { %p1267_p13 = pneg %p1266_p4 }
 0x473   : > { %p1272_p7 = pnand %p1270_p5, %p1267_p13 }
 0x475   : > { %1275 = shalt.err (!%p1272_p7)
}
 0x476   : > { %1034 = dma.vmem_to_hbm [thread:$0]  (%p1056_p12), %s790_s23, 128, %s1760_s30, [#allocation6]  }
 0x477   : > { %1313 = dma.done.wait (%p1056_p12), [#allocation6], 128  }
 0x478   : > { %1315 = vsyncadd (%p1056_p12), [#allocation6], 4294967168 }
 0x479 PF: > { %s1761_s17 = sld [smem:[#allocation17_spill]]  ;;  %s1762_s18 = sld [smem:[#allocation16_spill]] }
 0x47a   : > { %s1763_s13 = sld [smem:[#allocation19_spill]]  ;;  %s1764_s25 = sld [smem:[#allocation18_spill]] }
 0x47b   : > { %s1765_s11 = smov %s1322_s12  ;;  %s1767_s14 = smov %s1334_s15 }
 0x47f   : > { %s24_s16 = sadd.s32 1, %s1761_s17   ;;  %s1766_s12 = smov %s1762_s18 }
 0x480   : > { %p21_p0 = scmp.ge.s32.totalorder %s24_s16, 4   ;;  %s1768_s15 = smov %s1764_s25 }
 0x482   :  { %23 = sbr.rel (!%p21_p0) target bundleno = 9 (0x9), region = 127 }
 0x489   :  { %802 = vsyncpa [#allocation5], 1 }
 0x48a   :  { %804 = vsyncpa [#allocation5 + $0x1], 1 }
 0x48b   :  { %805 = vsyncpa [#allocation8], 1 }
 0x48c   :  { %806 = vsyncpa [#allocation6], 1 }
 0x48d   :  { %808 = vsyncpa [#allocation6 + $0x1], 1 }

// kernel: tpu_custom_call.1
= control target key start
LH: loop header
LB: loop body
LE: loop exit
PB: predicated region body
PF: predicated region fallthrough
CT: control target
= control target key end

     0   :  { %s1712_s0 = inlined_call_operand.hbm [shape: f32[8,16], index: 0, kind: input, shape index: {}]   ;;  %s1713_s1 = inlined_call_operand.hbm [shape: bf16[16,128], index: 1, kind: input, shape index: {}]   ;;  %s1714_s2 = inlined_call_operand.vmem [shape: f32[1,128], index: 2, kind: input, shape index: {}]   ;;  %s1715_s3 = inlined_call_operand.hbm [shape: bf16[2,128,128], index: 3, kind: input, shape index: {}]   ;;  %s1716_s4 = inlined_call_operand.vmem [shape: f32[2,1,128], index: 4, kind: input, shape index: {}]   ;;  %s1717_s5 = inlined_call_operand.hbm [shape: bf16[2,128,128], index: 5, kind: input, shape index: {}]   ;;  %s1718_s6 = inlined_call_operand.vmem [shape: f32[2,1,128], index: 6, kind: input, shape index: {}]   ;;  %s1719_s7 = inlined_call_operand.vmem [shape: bf16[1,128], index: 7, kind: input, shape index: {}]   ;;  %s1720_s8 = inlined_call_operand.<no memory space> [shape: f32[1,1], index: 8, kind: input, shape index: {}]   ;;  %s1721_s9 = inlined_call_operand.hbm [shape: f32[8,128], index: 9, kind: output, shape index: {}]  }
   0x1   :  { %1734 = sst [smem:[#allocation20_spill]] %s1712_s0  ;;  %v14_v0 = vstv %s1720_s8 }
   0x2   :  { %1735 = sst [smem:[#allocation21_spill]] %s1715_s3  ;;  %15 = vst [vmem:[#allocation3] sm:$0x1] %v14_v0 }
   0x3   :  { %1736 = sst [smem:[#allocation22_spill]] %s1721_s9 }
   0x4   :  { %16 = vsyncpa [#allocation5], 0 }
   0x5   :  { %17 = vsyncpa [#allocation8], 0 }
   0x6   :  { %18 = vsyncpa [#allocation6], 0  ;;  %s1405_s11 = smov 0   ;;  %s1407_s12 = smov 0  }
   0x7   :  { %s1409_s13 = smov 0   ;;  %s1411_s14 = smov 0  }
   0x8   :  { %s1413_s15 = smov 0   ;;  %s1415_s16 = smov 0  }
   0x9 LB: > { %1737 = sst [smem:[#allocation16_spill]] %s1326_s13  ;;  %s1434_s8 = sadd.s32 4294967295, %s1338_s16   ;;  %s1338_s16 = sphi %s1415_s16, %s24_s16   ;;  %s1334_s15 = sphi %s1413_s15, %s1768_s15   ;;  %s1330_s14 = sphi %s1411_s14, %s1767_s14   ;;  %s1326_s13 = sphi %s1409_s13, %s1763_s13   ;;  %s1322_s12 = sphi %s1407_s12, %s1766_s12   ;;  %s1318_s11 = sphi %s1405_s11, %s1765_s11  }
   0xa   : > { %1738 = sst [smem:[#allocation17_spill]] %s1338_s16  ;;  %s111_s17 = sadd.s32 1, %s1326_s13 }
   0xb   : > { %p118_p0 = scmp.ne.s32.totalorder %s1326_s13, %s1322_s12  ;;  %p119_p1 = scmp.eq.s32.totalorder %s1338_s16, 0 }
   0xc   : > { %p124_p2 = scmp.ne.s32.totalorder %s1322_s12, %s1318_s11  ;;  %p1722_p3 = scmp.eq.s32.totalorder %s1434_s8, 0 }
   0xd   : > { %p120_p4 = por %p119_p1, %p118_p0  ;;  %p910_p5 = scmp.ge.s32.totalorder %s1338_s16, 1 }
   0xe   : > { %p1445_p6 = por %p1722_p3, %p124_p2  ;;  %p281_p7 = scmp.lt.s32.totalorder %s1338_s16, 3 }
   0xf   : > { %s1340_s20 = smov [#allocation4]   ;;  %p1053_p10 = scmp.lt.s32.totalorder %s1338_s16, 2 }
  0x10   : > { %s1739_s18 = scalar_select %p1445_p6, 1, 0 }
  0x11   : > { %p1450_p8 = pnand %p910_p5, %p281_p7  ;;  %s296_s21 = sshll.u32 %s1340_s20, 4  ;;  %s297_s21 = int_to_ptr.vmem [resolvable:$true] %s296_s21 }
  0x12   : > { %p1463_p12 = pnand %p1053_p10, %p120_p4  ;;  %s1743_s0 = sld [smem:[#allocation20_spill]] }
  0x13   : > { %s1740_s19 = scalar_select %p1450_p8, 1, 0 }
  0x14   : > { %p1037_p9 = pneg %p1450_p8 }
  0x15   : > { %s1742_s23 = scalar_select %p1463_p12, 1, 0 }
  0x16   : > { %p1459_p11 = pnand %p1037_p9, %p1722_p3 }
  0x18   : > { %s1134_s26 = scalar_lea.hbm %s1743_s0, 128  ;;  %p1728_p0 = pneg %p1459_p11 }
  0x19   : > { %p1135_p13 = scmp.ne.s32.totalorder %s1743_s0, %s1134_s26  ;;  %p1141_p4 = scmp.lt.u32.totalorder %s1134_s26, %s1743_s0 }
  0x1b   : > { %p1137_p1 = pnand %p1728_p0, %p1135_p13 }
  0x1d   : > { %p1138_p2 = pneg %p1137_p1 }
  0x1f   : > { %p1143_p5 = pnand %p1141_p4, %p1138_p2 }
  0x21   : > { %1146 = shalt.err (!%p1143_p5)
}
  0x22   : > { %s1147_s10 = scalar_lea.vmem %s297_s21, 128  ;;  %p1155_p3 = scmp.lt.s32.totalorder %s297_s21, %s297_s21 }
  0x23   : > { %p1148_p7 = scmp.ne.s32.totalorder %s297_s21, %s1147_s10  ;;  %p1156_p6 = scmp.lt.s32.totalorder %s1147_s10, %s1147_s10 }
  0x25   : > { %p1150_p9 = pnand %p1148_p7, %p1728_p0  ;;  %p1157_p8 = por %p1156_p6, %p1155_p3 }
  0x27   : > { %p1151_p10 = pneg %p1150_p9 }
  0x29   : > { %p1158_p12 = pnand %p1157_p8, %p1151_p10 }
  0x2b   : > { %1161 = shalt.err (!%p1158_p12)
}
  0x2c   : > { %1040 = dma.hbm_to_vmem [thread:$0]  (!%p1459_p11), %s1743_s0, 128, %s297_s21, [#allocation5]  }
  0x2d   : > { %s33_s24 = sadd.s32 1, %s1334_s15  ;;  %s329_s25 = sand.u32 1, %s1338_s16  }
  0x2e   : > { %p34_p3 = scmp.ge.s32.totalorder %s33_s24, 2  ;;  %s331_s26 = sand.u32 1, %s1326_s13  }
  0x2f   : > { %s1727_s27 = sshll.u32 %s1334_s15, 10  ;;  %s1495_s28 = sshll.u32 %s331_s26, 6 }
  0x30   : > { %s1770_s24 = smov (%p34_p3, %s33_s24), 0  ;;  %s1745_s3 = sld [smem:[#allocation21_spill]] }
  0x31   : > { %1744 = sst [smem:[#allocation18_spill]] %s1770_s24  ;;  %s108_s21 = ssub.s32 %s1334_s15, %s1770_s24 }
  0x32   : > { %p109_p6 = scmp.eq.s32.totalorder %s108_s21, 0  ;;  %s333_s11 = scalar_lea.vmem [#allocation9], %s1495_s28 }
  0x33   : > { %s340_s20 = sshll.u32 %s333_s11, 4  ;;  %s1514_s0 = scalar_lea.sflag [#allocation5], %s329_s25  ;;  %s1507_s20 = int_to_ptr.vmem [resolvable:$true] %s340_s20 }
  0x34   : > { %s1512_s26 = scalar_select %p109_p6, %s1326_s13, %s111_s17  }
  0x35   : > { %p1747_p12 = scmp.ne.s32.totalorder %s1742_s23, 0 }
  0x36   : > { %s1502_s10 = scalar_lea.hbm %s1745_s3, %s1727_s27  ;;  %1746 = sst [smem:[#allocation19_spill]] %s1512_s26 }
  0x37   : > { %s1162_s16 = scalar_lea.hbm %s1502_s10, 1024  ;;  %p1732_p13 = pneg %p1747_p12 }
  0x38   : > { %p1163_p8 = scmp.ne.s32.totalorder %s1502_s10, %s1162_s16  ;;  %s1167_s21 = scalar_lea.hbm %s1745_s3, 2048 }
  0x39   : > { %p1168_p4 = scmp.lt.u32.totalorder %s1502_s10, %s1745_s3  ;;  %p1169_p5 = scmp.lt.u32.totalorder %s1167_s21, %s1162_s16 }
  0x3a   : > { %p1165_p1 = pnand %p1732_p13, %p1163_p8  ;;  %p1171_p9 = scmp.lt.u32.totalorder %s1162_s16, %s1502_s10 }
  0x3b   : > { %p1170_p7 = por %p1169_p5, %p1168_p4 }
  0x3c   : > { %p1166_p2 = pneg %p1165_p1 }
  0x3d   : > { %p1172_p10 = por %p1171_p9, %p1170_p7 }
  0x3f   : > { %p1173_p3 = pnand %p1172_p10, %p1166_p2 }
  0x41   : > { %1176 = shalt.err (!%p1173_p3)
}
  0x42   : > { %s1177_s17 = scalar_lea.vmem %s1507_s20, 1024  ;;  %s1341_s25 = smov [#allocation9]  }
  0x43   : > { %p1178_p6 = scmp.ne.s32.totalorder %s1507_s20, %s1177_s17  ;;  %s1182_s29 = sshll.u32 %s1341_s25, 4  ;;  %s1183_s29 = int_to_ptr.vmem [resolvable:$false] %s1182_s29 }
  0x44   : > { %s1184_s27 = scalar_lea.vmem %s1183_s29, 2048  ;;  %p1185_p0 = scmp.lt.s32.totalorder %s1507_s20, %s1183_s29 }
  0x45   : > { %p1180_p8 = pnand %p1178_p6, %p1732_p13  ;;  %p1186_p4 = scmp.lt.s32.totalorder %s1184_s27, %s1177_s17 }
  0x47   : > { %p1181_p1 = pneg %p1180_p8  ;;  %p1187_p5 = por %p1186_p4, %p1185_p0 }
  0x49   : > { %p1188_p7 = pnand %p1187_p5, %p1181_p1 }
  0x4b   : > { %1191 = shalt.err (!%p1188_p7)
}
  0x4c   : > { %s1342_s16 = smov 64   ;;  %s1343_s30 = smov 4  }
  0x4d   : > { %1047 = dma.hbm_to_vmem [thread:$0]  (!%p1747_p12), %s1502_s10, 1024, %s1507_s20, %s1514_s0, %s1342_s16, %s1342_s16, %s1343_s30  }
  0x4e   : > { %s1344_s21 = smov [#allocation7]   ;;  %s1748_s17 = sshll.u32 %s1334_s15, 10 }
  0x4f   : > { %s306_s11 = sshll.u32 %s1344_s21, 4  ;;  %s1550_s27 = scalar_lea.hbm %s1717_s5, %s1748_s17  ;;  %s307_s11 = int_to_ptr.vmem [resolvable:$true] %s306_s11 }
  0x50   : > { %s1192_s26 = scalar_lea.hbm %s1713_s1, 128  ;;  %p1749_p2 = pneg %p1459_p11 }
  0x51   : > { %p1193_p0 = scmp.ne.s32.totalorder %s1713_s1, %s1192_s26  ;;  %p1199_p3 = scmp.lt.u32.totalorder %s1192_s26, %s1713_s1 }
  0x53   : > { %p1195_p9 = pnand %p1193_p0, %p1749_p2 }
  0x55   : > { %p1196_p10 = pneg %p1195_p9 }
  0x57   : > { %p1201_p6 = pnand %p1199_p3, %p1196_p10 }
  0x59   : > { %1204 = shalt.err (!%p1201_p6)
}
  0x5a   : > { %s1205_s21 = scalar_lea.vmem %s307_s11, 128  ;;  %p1750_p1 = pmov %p1749_p2 }
  0x5b   : > { %p1206_p8 = scmp.ne.s32.totalorder %s307_s11, %s1205_s21  ;;  %p1213_p7 = scmp.lt.s32.totalorder %s307_s11, %s307_s11 }
  0x5c   : > { %p1214_p13 = scmp.lt.s32.totalorder %s1205_s21, %s1205_s21 }
  0x5d   : > { %p1208_p4 = pnand %p1206_p8, %p1750_p1 }
  0x5e   : > { %p1215_p12 = por %p1214_p13, %p1213_p7 }
  0x5f   : > { %p1209_p5 = pneg %p1208_p4 }
  0x61   : > { %p1216_p0 = pnand %p1215_p12, %p1209_p5 }
  0x63   : > { %1219 = shalt.err (!%p1216_p0)
}
  0x64   : > { %1043 = dma.hbm_to_vmem [thread:$0]  (!%p1459_p11), %s1713_s1, 128, %s307_s11, [#allocation8], %s1342_s16, %s1342_s16, %s1343_s30  }
  0x65   : > { %s360_s13 = scalar_lea.vmem [#allocation10], %s1495_s28  ;;  %s1220_s26 = scalar_lea.hbm %s1550_s27, 1024 }
  0x66   : > { %s367_s24 = sshll.u32 %s360_s13, 4  ;;  %p1221_p12 = scmp.ne.s32.totalorder %s1550_s27, %s1220_s26  ;;  %s1576_s24 = int_to_ptr.vmem [resolvable:$true] %s367_s24 }
  0x67   : > { %p1751_p13 = scmp.ne.s32.totalorder %s1742_s23, 0  ;;  %s1225_s25 = scalar_lea.hbm %s1717_s5, 2048 }
  0x68   : > { %p1226_p3 = scmp.lt.u32.totalorder %s1550_s27, %s1717_s5  ;;  %p1227_p6 = scmp.lt.u32.totalorder %s1225_s25, %s1220_s26 }
  0x69   : > { %p1752_p2 = pneg %p1751_p13  ;;  %p1229_p8 = scmp.lt.u32.totalorder %s1220_s26, %s1550_s27 }
  0x6a   : > { %p1228_p11 = por %p1227_p6, %p1226_p3 }
  0x6b   : > { %p1223_p9 = pnand %p1221_p12, %p1752_p2 }
  0x6c   : > { %p1230_p1 = por %p1229_p8, %p1228_p11 }
  0x6d   : > { %p1224_p10 = pneg %p1223_p9 }
  0x6f   : > { %p1231_p4 = pnand %p1230_p1, %p1224_p10 }
  0x71   : > { %1234 = shalt.err (!%p1231_p4)
}
  0x72   : > { %s1235_s28 = scalar_lea.vmem %s1576_s24, 1024  ;;  %p1753_p7 = pmov %p1752_p2 }
  0x73   : > { %p1236_p5 = scmp.ne.s32.totalorder %s1576_s24, %s1235_s28  ;;  %s1345_s11 = smov [#allocation10]  }
  0x74   : > { %s1240_s20 = sshll.u32 %s1345_s11, 4  ;;  %s1241_s20 = int_to_ptr.vmem [resolvable:$false] %s1240_s20 }
  0x75   : > { %p1238_p0 = pnand %p1236_p5, %p1753_p7  ;;  %s1242_s21 = scalar_lea.vmem %s1241_s20, 2048 }
  0x76   : > { %p1243_p2 = scmp.lt.s32.totalorder %s1576_s24, %s1241_s20  ;;  %p1244_p9 = scmp.lt.s32.totalorder %s1242_s21, %s1235_s28 }
  0x77   : > { %p1239_p12 = pneg %p1238_p0 }
  0x78   : > { %p1245_p3 = por %p1244_p9, %p1243_p2 }
  0x7a   : > { %p1246_p6 = pnand %p1245_p3, %p1239_p12 }
  0x7c   : > { %1249 = shalt.err (!%p1246_p6)
}
  0x7d   : > { %1050 = dma.hbm_to_vmem [thread:$0]  (!%p1751_p13), %s1550_s27, 1024, %s1576_s24, %s1514_s0, %s1342_s16, %s1342_s16, %s1343_s30  }
  0x7e   : > { %p1754_p10 = scmp.ne.s32.totalorder %s1740_s19, 0 }
  0x7f   : > { %p1755_p11 = scmp.eq.s32.totalorder (!%p1754_p10), %s1434_s8, 0 }
  0x80   : > { %385 = sbr.rel (%p1754_p10) target bundleno = 1145 (0x479), region = 56 }
  0x87   : > { %1301 = dma.done.wait (%p1755_p11), [#allocation5], 128   ;;  %p1756_p8 = pmov %p1755_p11 }
  0x89   : > { %1303 = vsyncadd (%p1756_p8), [#allocation5], 4294967168  ;;  %p1757_p1 = pmov %p1756_p8 }
  0x8b   : > { %1305 = dma.done.wait (%p1757_p1), [#allocation8], 128   ;;  %p1758_p4 = pmov %p1757_p1 }
  0x8c   : > { %s395_s23 = sand.u32 1, %s1434_s8   ;;  %s397_s0 = sand.u32 1, %s1322_s12  }
  0x8d   : > { %1307 = vsyncadd (%p1758_p4), [#allocation8], 4294967168  ;;  %s923_s16 = sshll.u32 %s397_s0, 6  ;;  %s396_s19 = scalar_lea.sflag [#allocation5], %s395_s23 }
  0x8e   : > { %s1617_s30 = scalar_lea.vmem [#allocation9], %s923_s16  ;;  %p1759_p13 = scmp.ne.s32.totalorder %s1739_s18, 0 }
  0x90   : > { %1309 = dma.done.wait (%p1759_p13), %s396_s19, 2048  }
  0x91   : > { %1311 = vsyncadd (%p1759_p13), %s396_s19, 4294965248  ;;  %p449_p5 = scmp.lt.s32.totalorder %s1330_s14, 1  ;;  %s1635_s17 = scalar_lea.vmem [#allocation10], %s923_s16 }
  0x92   : > { %p925_p7 = scmp.ne.s32.totalorder %s1330_s14, 0 }
  0x93   : > { %s1625_s27 = scalar_select %p449_p5, %s1330_s14, 1 }
  0x94   : > { %459 = sbr.rel (%p925_p7) target bundleno = 370 (0x172), region = 76  ;;  %v1116_v1 = vld [vmem:[#allocation7] sm:$0xff] (!%p925_p7)   ;;  %v1346_v2 = vmov (!%p925_p7), 0.0   ;;  %v460_v3 = vld [vmem:[#allocation4] sm:$0xff] (!%p925_p7)  ;;  %vm1347_vm0 = vmmov (!%p925_p7), 0   ;;  %vm477_vm1 = vcmask (!%p925_p7), 130048  }
  0x95   : > { %s451_s13 = scalar_lea.vmem %s1716_s4, %s1625_s27  ;;  %s454_s22 = scalar_lea.vmem %s1718_s6, %s1625_s27  ;;  %975 = vmatprep.subr.bf16.mxu0 (!%p925_p7), %v1346_v2  ;;  %977 = vmatprep.mubr.msk.bf16.mxu0 (!%p925_p7), %vm1347_vm0, %v1346_v2  ;;  %v461_v4 = vpack.c.bf16 (!%p925_p7), %v460_v3, %v460_v3  ;;  %v926_v5 = vld [vmem:[%s1714_s2] ss:$0 sm:$0xff] (!%p925_p7) }
  0x96   : > { %976 = vmatpush3.bf16.msra.mxu0 (!%p925_p7), %v1116_v1 }
  0x99   : > { %978 = vmatmul.mubr.msk.bf16.vlgmr.msra.gmra.mrb[0].mxu0 (!%p925_p7), %vm477_vm1, %v461_v4 }
 0x16c   : > { %v515_v6 = vpop.f32.mrb[0].mxu0 }
 0x16d   : > { %v516_v7 = vadd.f32 %v926_v5, %v515_v6  ;;  %v979_v8 = vpop.f32.mrb[1].mxu0 }
 0x16e   : > { %v518_v9 = vpop.f32.mrb[2].mxu0 }
 0x16f   : > { %v521_v10 = vmax.f32 %v516_v7, 0.0  ;;  %v980_v11 = vpop.f32.mrb[3].mxu0 }
 0x171   : > { %522 = vst [vmem:[#allocation2] sm:$0xff] %v521_v10 }
 0x172 PF: > { %v1117_v12 = vld [vmem:[%s1617_s30] sm:$0xff]   ;;  %v1348_v13 = vmov 0.0   ;;  %v1118_v14 = vld [vmem:[%s1617_s30 + $0x8] sm:$0xff]   ;;  %vm1349_vm2 = vmmov 0   ;;  %v1119_v15 = vld [vmem:[%s1617_s30 + $0x10] sm:$0xff]   ;;  %p947_p0 = scmp.ne.s32.totalorder %s1330_s14, 1 }
 0x173   : > { %981 = vmatprep.subr.bf16.mxu0 %v1348_v13  ;;  %1001 = vmatprep.subr.bf16.mxu1 %v1348_v13  ;;  %v1125_v16 = vld [vmem:[%s1635_s17] sm:$0xff]   ;;  %v1120_v17 = vld [vmem:[%s1617_s30 + $0x18] sm:$0xff]   ;;  %v1126_v18 = vld [vmem:[%s1635_s17 + $0x8] sm:$0xff]   ;;  %v759_v48 = vlaneseq (!%p947_p0)  ;;  %v1350_v54 = vmov (!%p947_p0), 0  }
 0x174   : > { %982 = vmatpush3.bf16.msra.mxu0 %v1117_v12  ;;  %997 = vmatprep.mubr.msk.bf16.mxu0 %vm1349_vm2, %v1348_v13  ;;  %v1121_v19 = vld [vmem:[%s1617_s30 + $0x20] sm:$0xff]   ;;  %v1127_v20 = vld [vmem:[%s1635_s17 + $0x10] sm:$0xff]   ;;  %v1122_v21 = vld [vmem:[%s1617_s30 + $0x28] sm:$0xff]  }
 0x175   : > { %983 = vmatprep.subr.bf16.mxu0 %v1348_v13  ;;  %1017 = vmatprep.mubr.msk.bf16.mxu1 %vm1349_vm2, %v1348_v13  ;;  %v1128_v22 = vld [vmem:[%s1635_s17 + $0x18] sm:$0xff]   ;;  %v1123_v23 = vld [vmem:[%s1617_s30 + $0x30] sm:$0xff]   ;;  %v1129_v24 = vld [vmem:[%s1635_s17 + $0x20] sm:$0xff]   ;;  %v760_v50 = vshrl.u32 (!%p947_p0), %v759_v48, 7 }
 0x176   : > { %1002 = vmatpush3.bf16.msra.mxu1 %v1125_v16  ;;  %v1124_v25 = vld [vmem:[%s1617_s30 + $0x38] sm:$0xff]   ;;  %v1130_v27 = vld [vmem:[%s1635_s17 + $0x28] sm:$0xff]   ;;  %v1131_v29 = vld [vmem:[%s1635_s17 + $0x30] sm:$0xff]   ;;  %1133 = vset.pattern.permute.xlu0 (!%p947_p0), %v1350_v54 }
 0x177   : > { %1003 = vmatprep.subr.bf16.mxu1 %v1348_v13  ;;  %v1132_v30 = vld [vmem:[%s1635_s17 + $0x38] sm:$0xff]   ;;  %v929_v31 = vld [vmem:[%s451_s13] ss:$0 sm:$0xff]  ;;  %v761_v51 = vsub.s32 (!%p947_p0), 0, %v760_v50  ;;  %v948_v55 = vld [vmem:[#allocation3] ss:$0 sm:$0xff] (!%p947_p0) }
 0x178   : > { %984 = vmatpush3.bf16.msra.mxu0 %v1118_v14  ;;  %v523_v26 = vld [vmem:[#allocation2] sm:$0xff] }
 0x179   : > { %985 = vmatprep.subr.bf16.mxu0 %v1348_v13  ;;  %v558_v28 = vpack.c.bf16 %v523_v26, %v523_v26  ;;  %v946_v39 = vld [vmem:[%s454_s22] ss:$0 sm:$0xff] }
 0x17a   : > { %1004 = vmatpush3.bf16.msra.mxu1 %v1126_v18  ;;  %v757_v47 = vld [vmem:[%s1719_s7] sm:$0x1] (!%p947_p0) }
 0x17b   : > { %1005 = vmatprep.subr.bf16.mxu1 %v1348_v13  ;;  %v758_v49 = vunpack.c.l.bf16 (!%p947_p0), %v757_v47 }
 0x17c   : > { %986 = vmatpush3.bf16.msra.mxu0 %v1119_v15 }
 0x17d   : > { %987 = vmatprep.subr.bf16.mxu0 %v1348_v13  ;;  %v762_v52 = vrot.slane (!%p947_p0), %v758_v49, %v761_v51 }
 0x17e   : > { %1006 = vmatpush3.bf16.msra.mxu1 %v1127_v20 }
 0x17f   : > { %1007 = vmatprep.subr.bf16.mxu1 %v1348_v13 }
 0x180   : > { %988 = vmatpush3.bf16.msra.mxu0 %v1120_v17 }
 0x181   : > { %989 = vmatprep.subr.bf16.mxu0 %v1348_v13 }
 0x182   : > { %1008 = vmatpush3.bf16.msra.mxu1 %v1128_v22 }
 0x183   : > { %1009 = vmatprep.subr.bf16.mxu1 %v1348_v13 }
 0x184   : > { %990 = vmatpush3.bf16.msra.mxu0 %v1121_v19 }
 0x185   : > { %991 = vmatprep.subr.bf16.mxu0 %v1348_v13 }
 0x186   : > { %1010 = vmatpush3.bf16.msra.mxu1 %v1129_v24 }
 0x187   : > { %1011 = vmatprep.subr.bf16.mxu1 %v1348_v13 }
 0x188   : > { %992 = vmatpush3.bf16.msra.mxu0 %v1122_v21 }
 0x189   : > { %993 = vmatprep.subr.bf16.mxu0 %v1348_v13 }
 0x18a   : > { %1012 = vmatpush3.bf16.msra.mxu1 %v1130_v27 }
 0x18b   : > { %1013 = vmatprep.subr.bf16.mxu1 %v1348_v13 }
 0x18c   : > { %994 = vmatpush3.bf16.msra.mxu0 %v1123_v23 }
 0x18d   : > { %995 = vmatprep.subr.bf16.mxu0 %v1348_v13 }
 0x18e   : > { %1014 = vmatpush3.bf16.msra.mxu1 %v1131_v29 }
 0x18f   : > { %1015 = vmatprep.subr.bf16.mxu1 %v1348_v13 }
 0x190   : > { %996 = vmatpush3.bf16.msra.mxu0 %v1124_v25 }
 0x192   : > { %1016 = vmatpush3.bf16.msra.mxu1 %v1132_v30 }
 0x193   : > { %998 = vmatmul.mubr.bf16.vlgmr.msra.gmra.mrb[0].mxu0 %v558_v28 }
 0x266   : > { %v647_v32 = vpop.f32.mrb[0].mxu0 }
 0x267   : > { %v648_v33 = vadd.f32 %v929_v31, %v647_v32  ;;  %v999_v34 = vpop.f32.mrb[1].mxu0 }
 0x268   : > { %v650_v35 = vpop.f32.mrb[2].mxu0 }
 0x269   : > { %v653_v36 = vmax.f32 %v648_v33, 0.0  ;;  %v1000_v37 = vpop.f32.mrb[3].mxu0 }
 0x26b   : > { %v654_v38 = vpack.c.bf16 %v653_v36, %v653_v36 }
 0x26d   : > { %1018 = vmatmul.mubr.bf16.vlgmr.msra.gmra.mrb[0].mxu1 %v654_v38 }
 0x340   : > { %v737_v40 = vpop.f32.mrb[0].mxu1 }
 0x341   : > { %v743_v41 = vadd.f32 %v737_v40, %v523_v26  ;;  %v1019_v42 = vpop.f32.mrb[1].mxu1  ;;  %756 = sbr.rel (%p947_p0) target bundleno = 1114 (0x45a), region = 80 }
 0x342   : > { %v740_v43 = vpop.f32.mrb[2].mxu1 }
 0x343   : > { %v750_v44 = vadd.f32 %v946_v39, %v743_v41  ;;  %v1020_v45 = vpop.f32.mrb[3].mxu1 }
 0x345   : > { %v751_v46 = vmax.f32 %v750_v44, 0.0 }
 0x347   : > { %752 = vst [vmem:[#allocation2] sm:$0xff] %v751_v46  ;;  %v763_v53 = vmul.f32 (!%p947_p0), %v762_v52, %v751_v46 }
 0x349   : > { %764 = vadd.xlane.f32.xlu0 %v763_v53 }
 0x3d6   : > { %v765_v56 = vpop.xlane.xlu0 %764 }
 0x3d7   : > { %v773_v57 = vadd.f32 %v948_v55, %v765_v56 }
 0x3d9   : > { %776 = vperm.xlu0 %1133, %v773_v57  }
 0x458   : > { %v777_v58 = vpop.permute.xlu0 %776 }
 0x459   : > { %779 = vst [vmem:[#allocation11] sm:$0xff] %v777_v58 }
 0x45a PF: > { %p1056_p12 = scmp.eq.s32.totalorder %s1434_s8, 1  ;;  %s1351_s14 = smov [#allocation11]  }
 0x45b   : > { %s789_s23 = sshll.u32 %s1351_s14, 4  ;;  %s790_s23 = int_to_ptr.vmem [resolvable:$true] %s789_s23 }
 0x45c   : > { %s1250_s0 = scalar_lea.vmem %s790_s23, 128  ;;  %p1257_p6 = scmp.lt.s32.totalorder %s790_s23, %s790_s23 }
 0x45d   : > { %p1251_p2 = scmp.ne.s32.totalorder %s790_s23, %s1250_s0  ;;  %p1258_p10 = scmp.lt.s32.totalorder %s1250_s0, %s1250_s0 }
 0x45f   : > { %p1252_p9 = pnand %p1251_p2, %p1056_p12  ;;  %p1259_p11 = por %p1258_p10, %p1257_p6 }
 0x461   : > { %p1253_p3 = pneg %p1252_p9 }
 0x463   : > { %p1260_p8 = pnand %p1259_p11, %p1253_p3 }
 0x465   : > { %1263 = shalt.err (!%p1260_p8)
}
 0x466   : > { %s1760_s30 = sld [smem:[#allocation22_spill]] }
 0x46c   : > { %s1264_s27 = scalar_lea.hbm %s1760_s30, 128 }
 0x46d   : > { %p1265_p1 = scmp.ne.s32.totalorder %s1760_s30, %s1264_s27  ;;  %p1270_p5 = scmp.lt.u32.totalorder %s1264_s27, %s1760_s30 }
 0x46f   : > { %p1266_p4 = pnand %p1265_p1, %p1056_p12 }
 0x471   : > { %p1267_p13 = pneg %p1266_p4 }
 0x473   : > { %p1272_p7 = pnand %p1270_p5, %p1267_p13 }
 0x475   : > { %1275 = shalt.err (!%p1272_p7)
}
 0x476   : > { %1034 = dma.vmem_to_hbm [thread:$0]  (%p1056_p12), %s790_s23, 128, %s1760_s30, [#allocation6]  }
 0x477   : > { %1313 = dma.done.wait (%p1056_p12), [#allocation6], 128  }
 0x478   : > { %1315 = vsyncadd (%p1056_p12), [#allocation6], 4294967168 }
 0x479 PF: > { %s1761_s17 = sld [smem:[#allocation17_spill]]  ;;  %s1762_s18 = sld [smem:[#allocation16_spill]] }
 0x47a   : > { %s1763_s13 = sld [smem:[#allocation19_spill]]  ;;  %s1764_s25 = sld [smem:[#allocation18_spill]] }
 0x47b   : > { %s1765_s11 = smov %s1322_s12  ;;  %s1767_s14 = smov %s1334_s15 }
 0x47f   : > { %s24_s16 = sadd.s32 1, %s1761_s17   ;;  %s1766_s12 = smov %s1762_s18 }
 0x480   : > { %p21_p0 = scmp.ge.s32.totalorder %s24_s16, 4   ;;  %s1768_s15 = smov %s1764_s25 }
 0x482   :  { %23 = sbr.rel (!%p21_p0) target bundleno = 9 (0x9), region = 127 }
 0x489   :  { %802 = vsyncpa [#allocation5], 1 }
 0x48a   :  { %804 = vsyncpa [#allocation5 + $0x1], 1 }
 0x48b   :  { %805 = vsyncpa [#allocation8], 1 }
 0x48c   :  { %806 = vsyncpa [#allocation6], 1 }
 0x48d   :  { %808 = vsyncpa [#allocation6 + $0x1], 1 }

</bundles_post_ra>
